<compile_context>
chip_gen: v5e
topology: v5e:2x2
jax: 0.10.0
libtpu: 0.0.40
codegen_flags: <defaults>
</compile_context>

<pallas_src>
import jax
import jax.numpy as jnp
from jax.experimental import pallas as pl
from jax.experimental.pallas import tpu as pltpu


def small_cell_kernel(x_ref, w1_ref, b1_ref, w2_ref, b2_ref, o_ref):
    # In-kernel cast of the activation tile (free on the VPU, hides under DMA/MXU).
    x = x_ref[...].astype(w1_ref.dtype)
    # Linear 1 on the MXU: bf16 x bf16 -> f32 accumulator.
    h = jnp.dot(x, w1_ref[...], preferred_element_type=jnp.float32)
    # Bias + ReLU on the f32 accumulator; round to bf16 only for the second MXU pass.
    h = jnp.maximum(h + b1_ref[...], 0.0).astype(w2_ref.dtype)
    # Linear 2 on the MXU.
    y = jnp.dot(h, w2_ref[...], preferred_element_type=jnp.float32)
    o_ref[...] = (y + b2_ref[...]).astype(o_ref.dtype)


def _round_up(n, m):
    return ((n + m - 1) // m) * m


def _device_vmem_bytes():
    try:
        cap = int(pltpu.get_tpu_info().vmem_capacity_bytes)
        if cap > 0:
            return cap
    except Exception:
        pass
    return 64 * 1024 * 1024  # conservative fallback (v7x per-TC VMEM)


def small_cell_forward(x, w1, b1, w2, b2, *, block_b=512,
                       compute_dtype=jnp.bfloat16, out_dtype=None):
    """x: (B, input_size) -> (B, 4*hidden_size). Weights are (in, out)."""
    batch, in_dim = x.shape
    mid = w1.shape[1]
    out_dim = w2.shape[1]
    out_dtype = x.dtype if out_dtype is None else jnp.dtype(out_dtype)

    x_it = jnp.dtype(x.dtype).itemsize
    c_it = jnp.dtype(compute_dtype).itemsize
    o_it = jnp.dtype(out_dtype).itemsize

    # Resident weights/biases. Budget assumes double buffering; if Buffered(1)
    # is accepted below it only adds headroom.
    weight_bytes = 2 * ((in_dim * mid + mid * out_dim) * c_it + (mid + out_dim) * 4)

    def act_bytes(tb):  # double-buffered activation tiles (x in, y out)
        return 2 * tb * (in_dim * x_it + out_dim * o_it)

    vmem_cap = _device_vmem_bytes()
    vmem_budget = (vmem_cap * 3) // 4

    # Prefer one grid step for the whole (sublane-padded) batch when it fits:
    # on single-TC v5e/v6e a multi-step grid is a serial loop whose per-step
    # overhead rivals this kernel's total DMA time, and at small batch a v7x
    # megacore split only duplicates weight DMA and half-fills each MXU.
    full_tb = _round_up(batch, 8)
    if act_bytes(full_tb) + weight_bytes <= vmem_budget:
        tb = full_tb
    else:
        tb = max(8, min((block_b // 8) * 8, full_tb))

    padded = _round_up(batch, tb)
    grid = (padded // tb,)

    xp = x if padded == batch else jnp.pad(x, ((0, padded - batch), (0, 0)))
    w1c = w1.astype(compute_dtype)
    w2c = w2.astype(compute_dtype)
    b1c = b1.reshape(1, mid).astype(jnp.float32)
    b2c = b2.reshape(1, out_dim).astype(jnp.float32)

    vmem_need = act_bytes(tb) + weight_bytes
    vmem_limit = int(min(vmem_cap, max(8 * 1024 * 1024, 2 * vmem_need)))

    cost = pl.CostEstimate(
        flops=2 * padded * (in_dim * mid + mid * out_dim),
        transcendentals=0,
        bytes_accessed=(xp.size * x_it + w1c.size * c_it + w2c.size * c_it
                        + b1c.size * 4 + b2c.size * 4 + padded * out_dim * o_it),
    )

    def make_call(weight_mode):
        wkw = {} if weight_mode is None else {"pipeline_mode": weight_mode}
        return pl.pallas_call(
            small_cell_kernel,
            out_shape=jax.ShapeDtypeStruct((padded, out_dim), out_dtype),
            grid=grid,
            in_specs=[
                pl.BlockSpec((tb, in_dim), lambda i: (i, 0)),           # batch-tiled x
                pl.BlockSpec((in_dim, mid), lambda i: (0, 0), **wkw),   # resident W1
                pl.BlockSpec((1, mid), lambda i: (0, 0), **wkw),        # resident b1
                pl.BlockSpec((mid, out_dim), lambda i: (0, 0), **wkw),  # resident W2
                pl.BlockSpec((1, out_dim), lambda i: (0, 0), **wkw),    # resident b2
            ],
            out_specs=pl.BlockSpec((tb, out_dim), lambda i: (i, 0)),
            compiler_params=pltpu.CompilerParams(
                dimension_semantics=("parallel",),  # only matters when grid > 1
                vmem_limit_bytes=vmem_limit,
            ),
            cost_estimate=cost,
        )

    try:
        # Constant-index weights/biases only need one VMEM buffer.
        y = make_call(pl.Buffered(1))(xp, w1c, b1c, w2c, b2c)
    except Exception:
        # Some jax versions reject buffer_count=1; default buffering is still correct.
        y = make_call(None)(xp, w1c, b1c, w2c, b2c)

    return y[:batch] if padded != batch else y


def init_params(key, input_size, hidden_size, dtype=jnp.float32):
    """Deterministic init mimicking nn.Linear's uniform(-1/sqrt(fan_in), +)."""
    mid = input_size // 4
    out = 4 * hidden_size
    k1, k2, k3, k4 = jax.random.split(key, 4)
    bound1 = 1.0 / jnp.sqrt(jnp.array(input_size, dtype))
    bound2 = 1.0 / jnp.sqrt(jnp.array(mid, dtype))
    w1 = jax.random.uniform(k1, (input_size, mid), dtype, -bound1, bound1)
    b1 = jax.random.uniform(k2, (1, mid), dtype, -bound1, bound1)
    w2 = jax.random.uniform(k3, (mid, out), dtype, -bound2, bound2)
    b2 = jax.random.uniform(k4, (1, out), dtype, -bound2, bound2)
    return w1, b1, w2, b2


if __name__ == "__main__":
    key = jax.random.PRNGKey(0)
    # Lane-dense sizes: intermediate = 512//4 = 128, output = 4*32 = 128.
    # batch 256 fits VMEM easily -> one grid step (no serial pipeline overhead).
    input_size = 512
    hidden_size = 32
    batch = 256

    kx, kp = jax.random.split(key)
    x = jax.random.normal(kx, (batch, input_size), jnp.float32)
    w1, b1, w2, b2 = init_params(kp, input_size, hidden_size)

    y = jax.block_until_ready(small_cell_forward(x, w1, b1, w2, b2))

    # Mixed-precision reference mirroring the kernel's bf16-MXU / f32-accumulate path.
    xb, w1b, w2b = (a.astype(jnp.bfloat16) for a in (x, w1, w2))
    h_ref = jnp.maximum(
        jnp.dot(xb, w1b, preferred_element_type=jnp.float32) + b1, 0.0)
    ref_mp = jnp.dot(h_ref.astype(jnp.bfloat16), w2b,
                     preferred_element_type=jnp.float32) + b2
    # Full-f32 reference (the PyTorch module's exact semantics); loose tolerance
    # for the intentional bf16 rounding of inputs/weights/activations.
    ref_f32 = jnp.maximum(x @ w1 + b1, 0.0) @ w2 + b2

    assert y.shape == (batch, 4 * hidden_size)
    assert y.dtype == x.dtype
    assert jnp.allclose(y, ref_mp, atol=1e-2, rtol=1e-2)
    assert jnp.allclose(y, ref_f32, atol=5e-2, rtol=5e-2)

    print("KERNEL_OK")
</pallas_src>

<mosaic_0001>
module attributes {stable_mosaic.version = 11 : i64} {
  func.func @small_cell_kernel(%arg0: i32, %arg1: memref<256x512xf32, #tpu.memory_space<vmem>>, %arg2: memref<512x128xbf16, #tpu.memory_space<vmem>>, %arg3: memref<1x128xf32, #tpu.memory_space<vmem>>, %arg4: memref<128x128xbf16, #tpu.memory_space<vmem>>, %arg5: memref<1x128xf32, #tpu.memory_space<vmem>>, %arg6: memref<256x128xf32, #tpu.memory_space<vmem>>) attributes {dimension_semantics = [#tpu.dimension_semantics<parallel>], iteration_bounds = array<i64: 1>, scalar_prefetch = 0 : i64, scratch_operands = 0 : i64, tpu.core_type = #tpu.core_type<tc>, window_params = [{transform_indices = @transform_0, window_bounds = array<i64: 256, 512>}, {pipeline_mode = #tpu.pipeline_mode<synchronous>, transform_indices = @transform_1, window_bounds = array<i64: 512, 128>}, {pipeline_mode = #tpu.pipeline_mode<synchronous>, transform_indices = @transform_2, window_bounds = array<i64: 1, 128>}, {pipeline_mode = #tpu.pipeline_mode<synchronous>, transform_indices = @transform_3, window_bounds = array<i64: 128, 128>}, {pipeline_mode = #tpu.pipeline_mode<synchronous>, transform_indices = @transform_4, window_bounds = array<i64: 1, 128>}, {transform_indices = @transform_5, window_bounds = array<i64: 256, 128>}]} {
    %c0 = arith.constant 0 : index
    %c0_0 = arith.constant 0 : index
    %0 = vector.load %arg1[%c0, %c0_0] : memref<256x512xf32, #tpu.memory_space<vmem>>, vector<256x512xf32>
    %1 = arith.truncf %0 : vector<256x512xf32> to vector<256x512xbf16>
    %c0_1 = arith.constant 0 : index
    %c0_2 = arith.constant 0 : index
    %2 = vector.load %arg2[%c0_1, %c0_2] : memref<512x128xbf16, #tpu.memory_space<vmem>>, vector<512x128xbf16>
    %cst = arith.constant dense<0.000000e+00> : vector<256x128xf32>
    %3 = tpu.matmul %1, %2, %cst {dimension_numbers = #tpu.dot_dimension_numbers<[1], [0], [0], [1], [0, 0, 1, 1], [], []>} : vector<256x512xbf16>, vector<512x128xbf16>, vector<256x128xf32> -> vector<256x128xf32>
    %c0_3 = arith.constant 0 : index
    %c0_4 = arith.constant 0 : index
    %4 = vector.load %arg3[%c0_3, %c0_4] : memref<1x128xf32, #tpu.memory_space<vmem>>, vector<1x128xf32>
    %5 = vector.broadcast %4 : vector<1x128xf32> to vector<256x128xf32>
    %6 = arith.addf %3, %5 : vector<256x128xf32>
    %cst_5 = arith.constant 0.000000e+00 : f32
    %7 = vector.broadcast %cst_5 : f32 to vector<256x128xf32>
    %8 = arith.maximumf %6, %7 : vector<256x128xf32>
    %9 = arith.truncf %8 : vector<256x128xf32> to vector<256x128xbf16>
    %c0_6 = arith.constant 0 : index
    %c0_7 = arith.constant 0 : index
    %10 = vector.load %arg4[%c0_6, %c0_7] : memref<128x128xbf16, #tpu.memory_space<vmem>>, vector<128x128xbf16>
    %cst_8 = arith.constant dense<0.000000e+00> : vector<256x128xf32>
    %11 = tpu.matmul %9, %10, %cst_8 {dimension_numbers = #tpu.dot_dimension_numbers<[1], [0], [0], [1], [0, 0, 1, 1], [], []>} : vector<256x128xbf16>, vector<128x128xbf16>, vector<256x128xf32> -> vector<256x128xf32>
    %c0_9 = arith.constant 0 : index
    %c0_10 = arith.constant 0 : index
    %12 = vector.load %arg5[%c0_9, %c0_10] : memref<1x128xf32, #tpu.memory_space<vmem>>, vector<1x128xf32>
    %13 = vector.broadcast %12 : vector<1x128xf32> to vector<256x128xf32>
    %14 = arith.addf %11, %13 : vector<256x128xf32>
    %c0_11 = arith.constant 0 : index
    %c0_12 = arith.constant 0 : index
    %15 = vector.load %arg6[%c0_11, %c0_12] : memref<256x128xf32, #tpu.memory_space<vmem>>, vector<256x128xf32>
    tpu.vector_store %arg6[%c0_11, %c0_12], %14 {strides = array<i32>} : memref<256x128xf32, #tpu.memory_space<vmem>>, vector<256x128xf32>,
    return
  }
  func.func @transform_0(%arg0: i32) -> (i32, i32) {
    %c0_i32 = arith.constant 0 : i32
    %c0_i32_0 = arith.constant 0 : i32
    return %arg0, %c0_i32 : i32, i32
  }
  func.func @transform_1(%arg0: i32) -> (i32, i32) {
    %c0_i32 = arith.constant 0 : i32
    %c0_i32_0 = arith.constant 0 : i32
    %c0_i32_1 = arith.constant 0 : i32
    return %c0_i32, %c0_i32_0 : i32, i32
  }
  func.func @transform_2(%arg0: i32) -> (i32, i32) {
    %c0_i32 = arith.constant 0 : i32
    %c0_i32_0 = arith.constant 0 : i32
    %c0_i32_1 = arith.constant 0 : i32
    return %c0_i32, %c0_i32_0 : i32, i32
  }
  func.func @transform_3(%arg0: i32) -> (i32, i32) {
    %c0_i32 = arith.constant 0 : i32
    %c0_i32_0 = arith.constant 0 : i32
    %c0_i32_1 = arith.constant 0 : i32
    return %c0_i32, %c0_i32_0 : i32, i32
  }
  func.func @transform_4(%arg0: i32) -> (i32, i32) {
    %c0_i32 = arith.constant 0 : i32
    %c0_i32_0 = arith.constant 0 : i32
    %c0_i32_1 = arith.constant 0 : i32
    return %c0_i32, %c0_i32_0 : i32, i32
  }
  func.func @transform_5(%arg0: i32) -> (i32, i32) {
    %c0_i32 = arith.constant 0 : i32
    %c0_i32_0 = arith.constant 0 : i32
    return %arg0, %c0_i32 : i32, i32
  }
}

module attributes {stable_mosaic.version = 11 : i64} {
  func.func @small_cell_kernel(%arg0: i32, %arg1: memref<256x512xf32, #tpu.memory_space<vmem>>, %arg2: memref<512x128xbf16, #tpu.memory_space<vmem>>, %arg3: memref<1x128xf32, #tpu.memory_space<vmem>>, %arg4: memref<128x128xbf16, #tpu.memory_space<vmem>>, %arg5: memref<1x128xf32, #tpu.memory_space<vmem>>, %arg6: memref<256x128xf32, #tpu.memory_space<vmem>>) attributes {dimension_semantics = [#tpu.dimension_semantics<parallel>], iteration_bounds = array<i64: 1>, scalar_prefetch = 0 : i64, scratch_operands = 0 : i64, tpu.core_type = #tpu.core_type<tc>, window_params = [{transform_indices = @transform_0, window_bounds = array<i64: 256, 512>}, {pipeline_mode = #tpu.pipeline_mode<synchronous>, transform_indices = @transform_1, window_bounds = array<i64: 512, 128>}, {pipeline_mode = #tpu.pipeline_mode<synchronous>, transform_indices = @transform_2, window_bounds = array<i64: 1, 128>}, {pipeline_mode = #tpu.pipeline_mode<synchronous>, transform_indices = @transform_3, window_bounds = array<i64: 128, 128>}, {pipeline_mode = #tpu.pipeline_mode<synchronous>, transform_indices = @transform_4, window_bounds = array<i64: 1, 128>}, {transform_indices = @transform_5, window_bounds = array<i64: 256, 128>}]} {
    %c0 = arith.constant 0 : index
    %c0_0 = arith.constant 0 : index
    %0 = vector.load %arg1[%c0, %c0_0] : memref<256x512xf32, #tpu.memory_space<vmem>>, vector<256x512xf32>
    %1 = arith.truncf %0 : vector<256x512xf32> to vector<256x512xbf16>
    %c0_1 = arith.constant 0 : index
    %c0_2 = arith.constant 0 : index
    %2 = vector.load %arg2[%c0_1, %c0_2] : memref<512x128xbf16, #tpu.memory_space<vmem>>, vector<512x128xbf16>
    %cst = arith.constant dense<0.000000e+00> : vector<256x128xf32>
    %3 = tpu.matmul %1, %2, %cst {dimension_numbers = #tpu.dot_dimension_numbers<[1], [0], [0], [1], [0, 0, 1, 1], [], []>} : vector<256x512xbf16>, vector<512x128xbf16>, vector<256x128xf32> -> vector<256x128xf32>
    %c0_3 = arith.constant 0 : index
    %c0_4 = arith.constant 0 : index
    %4 = vector.load %arg3[%c0_3, %c0_4] : memref<1x128xf32, #tpu.memory_space<vmem>>, vector<1x128xf32>
    %5 = vector.broadcast %4 : vector<1x128xf32> to vector<256x128xf32>
    %6 = arith.addf %3, %5 : vector<256x128xf32>
    %cst_5 = arith.constant 0.000000e+00 : f32
    %7 = vector.broadcast %cst_5 : f32 to vector<256x128xf32>
    %8 = arith.maximumf %6, %7 : vector<256x128xf32>
    %9 = arith.truncf %8 : vector<256x128xf32> to vector<256x128xbf16>
    %c0_6 = arith.constant 0 : index
    %c0_7 = arith.constant 0 : index
    %10 = vector.load %arg4[%c0_6, %c0_7] : memref<128x128xbf16, #tpu.memory_space<vmem>>, vector<128x128xbf16>
    %cst_8 = arith.constant dense<0.000000e+00> : vector<256x128xf32>
    %11 = tpu.matmul %9, %10, %cst_8 {dimension_numbers = #tpu.dot_dimension_numbers<[1], [0], [0], [1], [0, 0, 1, 1], [], []>} : vector<256x128xbf16>, vector<128x128xbf16>, vector<256x128xf32> -> vector<256x128xf32>
    %c0_9 = arith.constant 0 : index
    %c0_10 = arith.constant 0 : index
    %12 = vector.load %arg5[%c0_9, %c0_10] : memref<1x128xf32, #tpu.memory_space<vmem>>, vector<1x128xf32>
    %13 = vector.broadcast %12 : vector<1x128xf32> to vector<256x128xf32>
    %14 = arith.addf %11, %13 : vector<256x128xf32>
    %c0_11 = arith.constant 0 : index
    %c0_12 = arith.constant 0 : index
    %15 = vector.load %arg6[%c0_11, %c0_12] : memref<256x128xf32, #tpu.memory_space<vmem>>, vector<256x128xf32>
    tpu.vector_store %arg6[%c0_11, %c0_12], %14 {strides = array<i32>} : memref<256x128xf32, #tpu.memory_space<vmem>>, vector<256x128xf32>,
    return
  }
  func.func @transform_0(%arg0: i32) -> (i32, i32) {
    %c0_i32 = arith.constant 0 : i32
    %c0_i32_0 = arith.constant 0 : i32
    return %arg0, %c0_i32 : i32, i32
  }
  func.func @transform_1(%arg0: i32) -> (i32, i32) {
    %c0_i32 = arith.constant 0 : i32
    %c0_i32_0 = arith.constant 0 : i32
    %c0_i32_1 = arith.constant 0 : i32
    return %c0_i32, %c0_i32_0 : i32, i32
  }
  func.func @transform_2(%arg0: i32) -> (i32, i32) {
    %c0_i32 = arith.constant 0 : i32
    %c0_i32_0 = arith.constant 0 : i32
    %c0_i32_1 = arith.constant 0 : i32
    return %c0_i32, %c0_i32_0 : i32, i32
  }
  func.func @transform_3(%arg0: i32) -> (i32, i32) {
    %c0_i32 = arith.constant 0 : i32
    %c0_i32_0 = arith.constant 0 : i32
    %c0_i32_1 = arith.constant 0 : i32
    return %c0_i32, %c0_i32_0 : i32, i32
  }
  func.func @transform_4(%arg0: i32) -> (i32, i32) {
    %c0_i32 = arith.constant 0 : i32
    %c0_i32_0 = arith.constant 0 : i32
    %c0_i32_1 = arith.constant 0 : i32
    return %c0_i32, %c0_i32_0 : i32, i32
  }
  func.func @transform_5(%arg0: i32) -> (i32, i32) {
    %c0_i32 = arith.constant 0 : i32
    %c0_i32_0 = arith.constant 0 : i32
    return %arg0, %c0_i32 : i32, i32
  }
}

</mosaic_0001>

<bundles_post_ra>
// kernel: tpu_custom_call.1
= control target key start
LH: loop header
LB: loop body
LE: loop exit
PB: predicated region body
PF: predicated region fallthrough
CT: control target
= control target key end

     0   :  { %10 = vsyncpa [#allocation3], 0  ;;  %s1669_s0 = inlined_call_operand.hbm [shape: f32[256,512], index: 0, kind: input, shape index: {}]   ;;  %s1670_s1 = inlined_call_operand.hbm [shape: bf16[512,128], index: 1, kind: input, shape index: {}]   ;;  %s1671_s2 = inlined_call_operand.vmem [shape: f32[1,128], index: 2, kind: input, shape index: {}]   ;;  %s1672_s3 = inlined_call_operand.hbm [shape: bf16[128,128], index: 3, kind: input, shape index: {}]   ;;  %s1673_s4 = inlined_call_operand.vmem [shape: f32[1,128], index: 4, kind: input, shape index: {}]   ;;  %s1674_s5 = inlined_call_operand.hbm [shape: f32[256,128], index: 5, kind: output, shape index: {}]  }
   0x1   :  { %11 = vsyncpa [#allocation6], 0  ;;  %s30_s20 = sshll.u32 %s1670_s1, 4  ;;  %s31_s20 = int_to_ptr.hbm [resolvable:$true] %s30_s20 }
   0x2   :  { %12 = vsyncpa [#allocation4], 0  ;;  %s1471_s21 = smov [#allocation5]   ;;  %s17_s25 = sshll.u32 %s1669_s0, 4  ;;  %s18_s25 = int_to_ptr.hbm [resolvable:$true] %s17_s25 }
   0x3   :  { %s32_s22 = sshll.u32 %s1471_s21, 4  ;;  %s1472_s26 = smov 64   ;;  %s33_s22 = int_to_ptr.vmem [resolvable:$true] %s32_s22 }
   0x4   :  { %s1473_s27 = smov 4   ;;  %s1474_s28 = smov [#allocation2]  }
   0x5   :  { %38 = dma.hbm_to_vmem [thread:$0]  %s31_s20, 4096, %s33_s22, [#allocation6], %s1472_s26, %s1472_s26, %s1473_s27  }
   0x6   :  { %s19_s29 = sshll.u32 %s1474_s28, 4  ;;  %s1475_s30 = smov 512   ;;  %s20_s29 = int_to_ptr.vmem [resolvable:$true] %s19_s29 }
   0x7   :  { %s1476_s6 = smov 32   ;;  %s45_s8 = sshll.u32 %s1672_s3, 4  ;;  %s46_s8 = int_to_ptr.hbm [resolvable:$true] %s45_s8 }
   0x8   :  { %25 = dma.hbm_to_vmem [thread:$0]  %s18_s25, 16384, %s20_s29, [#allocation3], %s1475_s30, %s1475_s30, %s1476_s6  }
   0x9   :  { %s1477_s9 = smov [#allocation7]  }
   0xa   :  { %s47_s10 = sshll.u32 %s1477_s9, 4  ;;  %s48_s10 = int_to_ptr.vmem [resolvable:$true] %s47_s10 }
   0xb   :  { %53 = dma.hbm_to_vmem [thread:$0]  %s46_s8, 1024, %s48_s10, [#allocation6], %s1472_s26, %s1472_s26, %s1473_s27  }
   0xc   :  { %1465 = dma.done.wait [#allocation3], 16384  }
   0xd   :  { %1466 = vsyncadd [#allocation3], 4294950912 }
   0xe   :  { %1467 = dma.done.wait [#allocation6], 5120  }
   0xf   :  { %1468 = vsyncadd [#allocation6], 4294962176  ;;  %v1300_v0 = vld [vmem:[#allocation5 + $0x38] sm:$0xff]  ;;  %v1299_v1 = vld [vmem:[#allocation5 + $0x30] sm:$0xff]  ;;  %s1119_s15 = sshll.u32 %s1674_s5, 4  ;;  %s1479_s16 = smov 128   ;;  %s1120_s15 = int_to_ptr.hbm [resolvable:$true] %s1119_s15 }
  0x10   :  { %1333 = vmatpush.bf16.msra.mxu1 %v1300_v0  ;;  %1334 = vmatpush.bf16.msra.mxu2 %v1300_v0  ;;  %v1298_v2 = vld [vmem:[#allocation5 + $0x28] sm:$0xff]  ;;  %v1297_v3 = vld [vmem:[#allocation5 + $0x20] sm:$0xff]  ;;  %v1296_v4 = vld [vmem:[#allocation5 + $0x18] sm:$0xff]  ;;  %s1480_s17 = smov 8  }
  0x11   :  { %1335 = vmatpush.bf16.msra.mxu3 %v1300_v0  ;;  %520 = vmatpush.bf16.msra.mxu0 %v1300_v0  ;;  %v1295_v5 = vld [vmem:[#allocation5 + $0x10] sm:$0xff]  ;;  %v1294_v6 = vld [vmem:[#allocation5 + $0x8] sm:$0xff]  ;;  %v1293_v7 = vld [vmem:[#allocation5] sm:$0xff] }
  0x12   :  { %v100_v8 = vld [vmem:[#allocation2 + $0x100] sm:$0xff]  ;;  %v1316_v14 = vld [vmem:[#allocation5 + $0xb8] sm:$0xff]  ;;  %v1315_v20 = vld [vmem:[#allocation5 + $0xb0] sm:$0xff] }
  0x13   :  { %v104_v9 = vld [vmem:[#allocation2 + $0x120] sm:$0xff]  ;;  %v1324_v15 = vld [vmem:[#allocation5 + $0xf8] sm:$0xff]  ;;  %v1323_v21 = vld [vmem:[#allocation5 + $0xf0] sm:$0xff] }
  0x14   :  { %1336 = vmatpush.bf16.msra.mxu1 %v1299_v1  ;;  %1337 = vmatpush.bf16.msra.mxu2 %v1299_v1  ;;  %v132_v10 = vld [vmem:[#allocation2 + $0x200] sm:$0xff]  ;;  %v1308_v16 = vld [vmem:[#allocation5 + $0x78] sm:$0xff]  ;;  %v212_v17 = vpack.c.bf16 %v104_v9, %v100_v8  ;;  %v1307_v22 = vld [vmem:[#allocation5 + $0x70] sm:$0xff] }
  0x15   :  { %1338 = vmatpush.bf16.msra.mxu3 %v1299_v1  ;;  %521 = vmatpush.bf16.msra.mxu0 %v1299_v1  ;;  %v136_v11 = vld [vmem:[#allocation2 + $0x220] sm:$0xff]  ;;  %v1314_v23 = vld [vmem:[#allocation5 + $0xa8] sm:$0xff]  ;;  %v1312_v35 = vld [vmem:[#allocation5 + $0x98] sm:$0xff] }
  0x16   :  { %v164_v12 = vld [vmem:[#allocation2 + $0x300] sm:$0xff]  ;;  %v228_v18 = vpack.c.bf16 %v136_v11, %v132_v10  ;;  %v1322_v24 = vld [vmem:[#allocation5 + $0xe8] sm:$0xff]  ;;  %v1320_v36 = vld [vmem:[#allocation5 + $0xd8] sm:$0xff] }
  0x17   :  { %v168_v13 = vld [vmem:[#allocation2 + $0x320] sm:$0xff]  ;;  %v1306_v25 = vld [vmem:[#allocation5 + $0x68] sm:$0xff]  ;;  %v1304_v37 = vld [vmem:[#allocation5 + $0x58] sm:$0xff] }
  0x18   :  { %1339 = vmatpush.bf16.msra.mxu1 %v1298_v2  ;;  %1340 = vmatpush.bf16.msra.mxu2 %v1298_v2  ;;  %v244_v19 = vpack.c.bf16 %v168_v13, %v164_v12  ;;  %v1313_v26 = vld [vmem:[#allocation5 + $0xa0] sm:$0xff]  ;;  %v1311_v41 = vld [vmem:[#allocation5 + $0x90] sm:$0xff]  ;;  %v1310_v44 = vld [vmem:[#allocation5 + $0x88] sm:$0xff] }
  0x19   :  { %1341 = vmatpush.bf16.msra.mxu3 %v1298_v2  ;;  %522 = vmatpush.bf16.msra.mxu0 %v1298_v2  ;;  %v1321_v27 = vld [vmem:[#allocation5 + $0xe0] sm:$0xff]  ;;  %v1319_v42 = vld [vmem:[#allocation5 + $0xd0] sm:$0xff]  ;;  %v1318_v47 = vld [vmem:[#allocation5 + $0xc8] sm:$0xff] }
  0x1a   :  { %v1305_v28 = vld [vmem:[#allocation5 + $0x60] sm:$0xff]  ;;  %v1303_v43 = vld [vmem:[#allocation5 + $0x50] sm:$0xff]  ;;  %v1302_v48 = vld [vmem:[#allocation5 + $0x48] sm:$0xff] }
  0x1b   :  { %v108_v29 = vld [vmem:[#allocation2 + $0x140] sm:$0xff]  ;;  %v69_v13 = vld [vmem:[#allocation2 + $0x8] sm:$0xff] }
  0x1c   :  { %1342 = vmatpush.bf16.msra.mxu1 %v1297_v3  ;;  %1343 = vmatpush.bf16.msra.mxu2 %v1297_v3  ;;  %v112_v30 = vld [vmem:[#allocation2 + $0x160] sm:$0xff] }
  0x1d   :  { %1344 = vmatpush.bf16.msra.mxu3 %v1297_v3  ;;  %523 = vmatpush.bf16.msra.mxu0 %v1297_v3  ;;  %v140_v31 = vld [vmem:[#allocation2 + $0x240] sm:$0xff]  ;;  %v216_v38 = vpack.c.bf16 %v112_v30, %v108_v29  ;;  %v79_v29 = vld [vmem:[#allocation2 + $0x58] sm:$0xff] }
  0x1e   :  { %v144_v32 = vld [vmem:[#allocation2 + $0x260] sm:$0xff]  ;;  %v83_v30 = vld [vmem:[#allocation2 + $0x78] sm:$0xff] }
  0x1f   :  { %v172_v33 = vld [vmem:[#allocation2 + $0x340] sm:$0xff]  ;;  %v232_v39 = vpack.c.bf16 %v144_v32, %v140_v31 }
  0x20   :  { %1345 = vmatpush.bf16.msra.mxu1 %v1296_v4  ;;  %1346 = vmatpush.bf16.msra.mxu2 %v1296_v4  ;;  %v176_v34 = vld [vmem:[#allocation2 + $0x360] sm:$0xff] }
  0x21   :  { %1347 = vmatpush.bf16.msra.mxu3 %v1296_v4  ;;  %524 = vmatpush.bf16.msra.mxu0 %v1296_v4  ;;  %v248_v40 = vpack.c.bf16 %v176_v34, %v172_v33  ;;  %v68_v45 = vld [vmem:[#allocation2] sm:$0xff]  ;;  %v203_v33 = vpack.c.bf16 %v83_v30, %v79_v29  ;;  %v85_v34 = vld [vmem:[#allocation2 + $0x88] sm:$0xff] }
  0x22   :  { %v72_v46 = vld [vmem:[#allocation2 + $0x20] sm:$0xff] }
  0x23   :  { %v196_v49 = vpack.c.bf16 %v72_v46, %v68_v45  ;;  %v1309_v50 = vld [vmem:[#allocation5 + $0x80] sm:$0xff]  ;;  %v94_v45 = vld [vmem:[#allocation2 + $0xd0] sm:$0xff] }
  0x24   :  { %1348 = vmatpush.bf16.msra.mxu1 %v1295_v5  ;;  %1349 = vmatpush.bf16.msra.mxu2 %v1295_v5  ;;  %v1317_v51 = vld [vmem:[#allocation5 + $0xc0] sm:$0xff]  ;;  %v98_v46 = vld [vmem:[#allocation2 + $0xf0] sm:$0xff] }
  0x25   :  { %1350 = vmatpush.bf16.msra.mxu3 %v1295_v5  ;;  %525 = vmatpush.bf16.msra.mxu0 %v1295_v5  ;;  %v1301_v52 = vld [vmem:[#allocation5 + $0x40] sm:$0xff] }
  0x26   :  { %v116_v53 = vld [vmem:[#allocation2 + $0x180] sm:$0xff] }
  0x27   :  { %v120_v54 = vld [vmem:[#allocation2 + $0x1a0] sm:$0xff] }
  0x28   :  { %1351 = vmatpush.bf16.msra.mxu1 %v1294_v6  ;;  %1352 = vmatpush.bf16.msra.mxu2 %v1294_v6  ;;  %v148_v55 = vld [vmem:[#allocation2 + $0x280] sm:$0xff]  ;;  %v220_v59 = vpack.c.bf16 %v120_v54, %v116_v53  ;;  %v101_v53 = vld [vmem:[#allocation2 + $0x108] sm:$0xff] }
  0x29   :  { %1353 = vmatpush.bf16.msra.mxu3 %v1294_v6  ;;  %526 = vmatpush.bf16.msra.mxu0 %v1294_v6  ;;  %v152_v56 = vld [vmem:[#allocation2 + $0x2a0] sm:$0xff]  ;;  %v105_v54 = vld [vmem:[#allocation2 + $0x128] sm:$0xff] }
  0x2a   :  { %v180_v57 = vld [vmem:[#allocation2 + $0x380] sm:$0xff]  ;;  %v236_v60 = vpack.c.bf16 %v152_v56, %v148_v55  ;;  %v102_v55 = vld [vmem:[#allocation2 + $0x110] sm:$0xff] }
  0x2b   :  { %v184_v58 = vld [vmem:[#allocation2 + $0x3a0] sm:$0xff]  ;;  %v106_v56 = vld [vmem:[#allocation2 + $0x130] sm:$0xff] }
  0x2c   :  { %1354 = vmatpush.bf16.msra.mxu1 %v1293_v7  ;;  %1355 = vmatpush.bf16.msra.mxu2 %v1293_v7  ;;  %v252_v61 = vpack.c.bf16 %v184_v58, %v180_v57  ;;  %v76_v62 = vld [vmem:[#allocation2 + $0x40] sm:$0xff]  ;;  %v103_v57 = vld [vmem:[#allocation2 + $0x118] sm:$0xff] }
  0x2d   :  { %1356 = vmatpush.bf16.msra.mxu3 %v1293_v7  ;;  %527 = vmatpush.bf16.msra.mxu0 %v1293_v7  ;;  %v80_v63 = vld [vmem:[#allocation2 + $0x60] sm:$0xff]  ;;  %v107_v58 = vld [vmem:[#allocation2 + $0x138] sm:$0xff] }
  0x2e   :  { %v200_v0 = vpack.c.bf16 %v80_v63, %v76_v62  ;;  %v124_v1 = vld [vmem:[#allocation2 + $0x1c0] sm:$0xff]  ;;  %v215_v62 = vpack.c.bf16 %v107_v58, %v103_v57  ;;  %v1331_v63 = vld [vmem:[#allocation7 + $0x30] sm:$0xff]  ;;  %v137_v57 = vld [vmem:[#allocation2 + $0x228] sm:$0xff] }
  0x2f   :  { %548 = vmatmul.bf16.vlgmr.msra.gmra.mxu1 %v212_v17  ;;  %568 = vmatmul.bf16.vlgmr.msra.gmra.mxu2 %v228_v18  ;;  %v128_v2 = vld [vmem:[#allocation2 + $0x1e0] sm:$0xff]  ;;  %v71_v17 = vld [vmem:[#allocation2 + $0x18] sm:$0xff]  ;;  %v134_v58 = vld [vmem:[#allocation2 + $0x210] sm:$0xff] }
  0x30   :  { %698 = vmatpush.bf16.msrb.mxu2 %v1316_v14  ;;  %609 = vmatpush.bf16.msrb.mxu1 %v1308_v16  ;;  %v156_v3 = vld [vmem:[#allocation2 + $0x2c0] sm:$0xff]  ;;  %v224_v7 = vpack.c.bf16 %v128_v2, %v124_v1  ;;  %v73_v14 = vld [vmem:[#allocation2 + $0x28] sm:$0xff]  ;;  %v74_v16 = vld [vmem:[#allocation2 + $0x30] sm:$0xff] }
  0x31   :  { %787 = vmatpush.bf16.msrb.mxu3 %v1324_v15  ;;  %528 = vmatmul.bf16.vlgmr.msra.gmra.mxu0 %v196_v49  ;;  %v160_v4 = vld [vmem:[#allocation2 + $0x2e0] sm:$0xff]  ;;  %v70_v15 = vld [vmem:[#allocation2 + $0x10] sm:$0xff]  ;;  %v75_v18 = vld [vmem:[#allocation2 + $0x38] sm:$0xff] }
  0x32   :  { %588 = vmatmul.bf16.vlgmr.msra.gmra.mxu3 %v244_v19  ;;  %v188_v5 = vld [vmem:[#allocation2 + $0x3c0] sm:$0xff]  ;;  %v240_v8 = vpack.c.bf16 %v160_v4, %v156_v3  ;;  %v197_v19 = vpack.c.bf16 %v73_v14, %v69_v13  ;;  %v1330_v3 = vld [vmem:[#allocation7 + $0x28] sm:$0xff] }
  0x33   :  { %v192_v6 = vld [vmem:[#allocation2 + $0x3e0] sm:$0xff]  ;;  %v109_v4 = vld [vmem:[#allocation2 + $0x148] sm:$0xff] }
  0x34   :  { %699 = vmatpush.bf16.msrb.mxu2 %v1315_v20  ;;  %610 = vmatpush.bf16.msrb.mxu1 %v1307_v22  ;;  %v256_v9 = vpack.c.bf16 %v192_v6, %v188_v5  ;;  %v84_v10 = vld [vmem:[#allocation2 + $0x80] sm:$0xff]  ;;  %v198_v20 = vpack.c.bf16 %v74_v16, %v70_v15  ;;  %v113_v5 = vld [vmem:[#allocation2 + $0x168] sm:$0xff]  ;;  %v110_v6 = vld [vmem:[#allocation2 + $0x150] sm:$0xff] }
  0x35   :  { %788 = vmatpush.bf16.msrb.mxu3 %v1323_v21  ;;  %v88_v11 = vld [vmem:[#allocation2 + $0xa0] sm:$0xff]  ;;  %v199_v21 = vpack.c.bf16 %v75_v18, %v71_v17 }
  0x36   :  { %v204_v12 = vpack.c.bf16 %v88_v11, %v84_v10  ;;  %v92_v22 = vld [vmem:[#allocation2 + $0xc0] sm:$0xff] }
  0x37   :  { %v1329_v16 = vld [vmem:[#allocation7 + $0x20] sm:$0xff] }
  0x38   :  { %700 = vmatpush.bf16.msrb.mxu2 %v1314_v23  ;;  %611 = vmatpush.bf16.msrb.mxu1 %v1306_v25  ;;  %v96_v23 = vld [vmem:[#allocation2 + $0xe0] sm:$0xff]  ;;  %v77_v25 = vld [vmem:[#allocation2 + $0x48] sm:$0xff] }
  0x39   :  { %789 = vmatpush.bf16.msrb.mxu3 %v1322_v24  ;;  %v208_v24 = vpack.c.bf16 %v96_v23, %v92_v22  ;;  %v121_v22 = vld [vmem:[#allocation2 + $0x1a8] sm:$0xff]  ;;  %v118_v23 = vld [vmem:[#allocation2 + $0x190] sm:$0xff] }
  0x3c   :  { %701 = vmatpush.bf16.msrb.mxu2 %v1313_v26  ;;  %612 = vmatpush.bf16.msrb.mxu1 %v1305_v28  ;;  %v81_v26 = vld [vmem:[#allocation2 + $0x68] sm:$0xff]  ;;  %v82_v28 = vld [vmem:[#allocation2 + $0x70] sm:$0xff] }
  0x3d   :  { %790 = vmatpush.bf16.msrb.mxu3 %v1321_v27  ;;  %v78_v27 = vld [vmem:[#allocation2 + $0x50] sm:$0xff]  ;;  %v201_v31 = vpack.c.bf16 %v81_v26, %v77_v25  ;;  %v119_v25 = vld [vmem:[#allocation2 + $0x198] sm:$0xff] }
  0x3e   :  { %v202_v32 = vpack.c.bf16 %v82_v28, %v78_v27  ;;  %v123_v26 = vld [vmem:[#allocation2 + $0x1b8] sm:$0xff] }
  0x3f   :  { %553 = vmatmul.bf16.gmra.mxu1 %v216_v38  ;;  %573 = vmatmul.bf16.gmra.mxu2 %v232_v39  ;;  %v87_v38 = vld [vmem:[#allocation2 + $0x98] sm:$0xff] }
  0x40   :  { %702 = vmatpush.bf16.msrb.mxu2 %v1312_v35  ;;  %613 = vmatpush.bf16.msrb.mxu1 %v1304_v37  ;;  %v89_v35 = vld [vmem:[#allocation2 + $0xa8] sm:$0xff]  ;;  %v90_v37 = vld [vmem:[#allocation2 + $0xb0] sm:$0xff]  ;;  %v91_v39 = vld [vmem:[#allocation2 + $0xb8] sm:$0xff] }
  0x41   :  { %791 = vmatpush.bf16.msrb.mxu3 %v1320_v36  ;;  %533 = vmatmul.bf16.gmra.mxu0 %v200_v0  ;;  %v86_v36 = vld [vmem:[#allocation2 + $0x90] sm:$0xff] }
  0x42   :  { %593 = vmatmul.bf16.gmra.mxu3 %v248_v40  ;;  %v205_v40 = vpack.c.bf16 %v89_v35, %v85_v34 }
  0x44   :  { %703 = vmatpush.bf16.msrb.mxu2 %v1311_v41  ;;  %614 = vmatpush.bf16.msrb.mxu1 %v1303_v43  ;;  %v206_v41 = vpack.c.bf16 %v90_v37, %v86_v36  ;;  %v93_v43 = vld [vmem:[#allocation2 + $0xc8] sm:$0xff] }
  0x45   :  { %792 = vmatpush.bf16.msrb.mxu3 %v1319_v42  ;;  %v207_v42 = vpack.c.bf16 %v91_v39, %v87_v38  ;;  %v125_v37 = vld [vmem:[#allocation2 + $0x1c8] sm:$0xff] }
  0x46   :  { %v1326_v38 = vld [vmem:[#allocation7 + $0x8] sm:$0xff] }
  0x47   :  { %v129_v39 = vld [vmem:[#allocation2 + $0x1e8] sm:$0xff] }
  0x48   :  { %704 = vmatpush.bf16.msrb.mxu2 %v1310_v44  ;;  %615 = vmatpush.bf16.msrb.mxu1 %v1302_v48  ;;  %v97_v44 = vld [vmem:[#allocation2 + $0xe8] sm:$0xff]  ;;  %v99_v48 = vld [vmem:[#allocation2 + $0xf8] sm:$0xff] }
  0x49   :  { %793 = vmatpush.bf16.msrb.mxu3 %v1318_v47  ;;  %v95_v47 = vld [vmem:[#allocation2 + $0xd8] sm:$0xff]  ;;  %v209_v49 = vpack.c.bf16 %v97_v44, %v93_v43 }
  0x4a   :  { %v131_v43 = vld [vmem:[#allocation2 + $0x1f8] sm:$0xff] }
  0x4c   :  { %705 = vmatpush.bf16.msrb.mxu2 %v1309_v50  ;;  %616 = vmatpush.bf16.msrb.mxu1 %v1301_v52  ;;  %v210_v50 = vpack.c.bf16 %v98_v46, %v94_v45  ;;  %v1332_v52 = vld [vmem:[#allocation7 + $0x38] sm:$0xff]  ;;  %v225_v46 = vpack.c.bf16 %v129_v39, %v125_v37 }
  0x4d   :  { %794 = vmatpush.bf16.msrb.mxu3 %v1317_v51  ;;  %v211_v51 = vpack.c.bf16 %v99_v48, %v95_v47  ;;  %992 = vmatpush.bf16.msrb.mxu0 %v1332_v52 }
  0x4f   :  { %558 = vmatmul.bf16.gmra.mxu1 %v220_v59  ;;  %578 = vmatmul.bf16.gmra.mxu2 %v236_v60  ;;  %v213_v59 = vpack.c.bf16 %v105_v54, %v101_v53  ;;  %v214_v60 = vpack.c.bf16 %v106_v56, %v102_v55  ;;  %v133_v55 = vld [vmem:[#allocation2 + $0x208] sm:$0xff] }
  0x51   :  { %538 = vmatmul.bf16.gmra.mxu0 %v204_v12  ;;  %v217_v12 = vpack.c.bf16 %v113_v5, %v109_v4  ;;  %v229_v4 = vpack.c.bf16 %v137_v57, %v133_v55 }
  0x52   :  { %598 = vmatmul.bf16.gmra.mxu3 %v252_v61  ;;  %993 = vmatpush.bf16.msrb.mxu0 %v1331_v63 }
  0x56   :  { %994 = vmatpush.bf16.msrb.mxu0 %v1330_v3 }
  0x5a   :  { %995 = vmatpush.bf16.msrb.mxu0 %v1329_v16 }
  0x5f   :  { %563 = vmatmul.bf16.gmra.mxu1 %v224_v7  ;;  %583 = vmatmul.bf16.gmra.mxu2 %v240_v8  ;;  %v114_v7 = vld [vmem:[#allocation2 + $0x170] sm:$0xff]  ;;  %v111_v8 = vld [vmem:[#allocation2 + $0x158] sm:$0xff] }
  0x60   :  { %v218_v13 = vpack.c.bf16 %v114_v7, %v110_v6 }
  0x61   :  { %543 = vmatmul.bf16.gmra.mxu0 %v208_v24  ;;  %v122_v24 = vld [vmem:[#allocation2 + $0x1b0] sm:$0xff] }
  0x62   :  { %603 = vmatmul.bf16.gmra.mxu3 %v256_v9  ;;  %v115_v9 = vld [vmem:[#allocation2 + $0x178] sm:$0xff]  ;;  %v222_v30 = vpack.c.bf16 %v122_v24, %v118_v23  ;;  %v141_v23 = vld [vmem:[#allocation2 + $0x248] sm:$0xff] }
  0x63   :  { %v219_v15 = vpack.c.bf16 %v115_v9, %v111_v8  ;;  %v1571_v8 = vld [vmem:[%s1671_s2] ss:$0 sm:$0xff]  ;;  %v145_v24 = vld [vmem:[#allocation2 + $0x268] sm:$0xff] }
  0x6f   :  { %617 = vmatmul.bf16.vlgmr.msrb.gmra.mxu1 %v197_v19  ;;  %706 = vmatmul.bf16.vlgmr.msrb.gmra.mxu2 %v198_v20  ;;  %v1328_v20 = vld [vmem:[#allocation7 + $0x18] sm:$0xff] }
  0x70   :  { %996 = vmatpush.bf16.msrb.mxu0 %v1328_v20 }
  0x72   :  { %795 = vmatmul.bf16.vlgmr.msrb.gmra.mxu3 %v199_v21  ;;  %v117_v21 = vld [vmem:[#allocation2 + $0x188] sm:$0xff] }
  0x73   :  { %v221_v29 = vpack.c.bf16 %v121_v22, %v117_v21 }
  0x7f   :  { %622 = vmatmul.bf16.gmra.mxu1 %v201_v31  ;;  %711 = vmatmul.bf16.gmra.mxu2 %v202_v32  ;;  %v223_v32 = vpack.c.bf16 %v123_v26, %v119_v25  ;;  %v142_v25 = vld [vmem:[#allocation2 + $0x250] sm:$0xff] }
  0x80   :  { %v146_v26 = vld [vmem:[#allocation2 + $0x270] sm:$0xff] }
  0x82   :  { %800 = vmatmul.bf16.gmra.mxu3 %v203_v33  ;;  %v1327_v33 = vld [vmem:[#allocation7 + $0x10] sm:$0xff] }
  0x83   :  { %997 = vmatpush.bf16.msrb.mxu0 %v1327_v33 }
  0x87   :  { %998 = vmatpush.bf16.msrb.mxu0 %v1326_v38 }
  0x8f   :  { %627 = vmatmul.bf16.gmra.mxu1 %v205_v40  ;;  %716 = vmatmul.bf16.gmra.mxu2 %v206_v41  ;;  %v126_v40 = vld [vmem:[#allocation2 + $0x1d0] sm:$0xff] }
  0x90   :  { %v130_v41 = vld [vmem:[#allocation2 + $0x1f0] sm:$0xff] }
  0x91   :  { %v226_v47 = vpack.c.bf16 %v130_v41, %v126_v40  ;;  %v233_v40 = vpack.c.bf16 %v145_v24, %v141_v23  ;;  %v234_v41 = vpack.c.bf16 %v146_v26, %v142_v25 }
  0x92   :  { %805 = vmatmul.bf16.gmra.mxu3 %v207_v42  ;;  %v127_v42 = vld [vmem:[#allocation2 + $0x1d8] sm:$0xff] }
  0x9f   :  { %632 = vmatmul.bf16.gmra.mxu1 %v209_v49  ;;  %721 = vmatmul.bf16.gmra.mxu2 %v210_v50  ;;  %v227_v49 = vpack.c.bf16 %v131_v43, %v127_v42 }
  0xa2   :  { %810 = vmatmul.bf16.gmra.mxu3 %v211_v51  ;;  %v1325_v51 = vld [vmem:[#allocation7] sm:$0xff] }
  0xa3   :  { %999 = vmatpush.bf16.msrb.mxu0 %v1325_v51 }
  0xac   :  { %v1520_v61 = vpop.f32.mrf.mxu1 }
  0xae   :  { %v529_v50 = vpop.f32.mrf.mxu0 }
  0xaf   :  { %637 = vmatmul.bf16.gmra.mxu1 %v213_v59  ;;  %726 = vmatmul.bf16.gmra.mxu2 %v214_v60  ;;  %v138_v59 = vld [vmem:[#allocation2 + $0x230] sm:$0xff]  ;;  %v135_v60 = vld [vmem:[#allocation2 + $0x218] sm:$0xff]  ;;  %v530_v9 = vadd.f32 %v1571_v8, %v529_v50 }
  0xb0   :  { %v230_v5 = vpack.c.bf16 %v138_v59, %v134_v58 }
  0xb2   :  { %815 = vmatmul.bf16.gmra.mxu3 %v215_v62  ;;  %v1522_v0 = vpop.f32.mrf.mxu2  ;;  %v139_v62 = vld [vmem:[#allocation2 + $0x238] sm:$0xff] }
  0xb3   :  { %v231_v7 = vpack.c.bf16 %v139_v62, %v135_v60 }
  0xb4   :  { %v1526_v2 = vpop.f32.mrf.mxu1 }
  0xb5   :  { %v1524_v1 = vpop.f32.mrf.mxu3 }
  0xb6   :  { %v531_v56 = vpop.f32.mrf.mxu0 }
  0xb7   :  { %v532_v21 = vadd.f32 %v1571_v8, %v531_v56 }
  0xba   :  { %v1528_v10 = vpop.f32.mrf.mxu2 }
  0xbc   :  { %v1532_v14 = vpop.f32.mrf.mxu1 }
  0xbd   :  { %v1530_v11 = vpop.f32.mrf.mxu3 }
  0xbf   :  { %642 = vmatmul.bf16.gmra.mxu1 %v217_v12  ;;  %731 = vmatmul.bf16.gmra.mxu2 %v218_v13  ;;  %v534_v13 = vpop.f32.mrf.mxu0 }
  0xc0   :  { %v535_v50 = vadd.f32 %v1571_v8, %v534_v13  ;;  %v151_v13 = vld [vmem:[#allocation2 + $0x298] sm:$0xff] }
  0xc2   :  { %820 = vmatmul.bf16.gmra.mxu3 %v219_v15  ;;  %v1534_v17 = vpop.f32.mrf.mxu2 }
  0xc4   :  { %v1538_v19 = vpop.f32.mrf.mxu1 }
  0xc5   :  { %v1536_v18 = vpop.f32.mrf.mxu3 }
  0xc7   :  { %v536_v43 = vpop.f32.mrf.mxu0 }
  0xc8   :  { %v537_v62 = vadd.f32 %v1571_v8, %v536_v43 }
  0xca   :  { %v1540_v27 = vpop.f32.mrf.mxu2 }
  0xcc   :  { %v1544_v31 = vpop.f32.mrf.mxu1 }
  0xcd   :  { %v1542_v28 = vpop.f32.mrf.mxu3 }
  0xcf   :  { %647 = vmatmul.bf16.gmra.mxu1 %v221_v29  ;;  %736 = vmatmul.bf16.gmra.mxu2 %v222_v30  ;;  %v143_v30 = vld [vmem:[#allocation2 + $0x258] sm:$0xff]  ;;  %v539_v60 = vpop.f32.mrf.mxu0 }
  0xd2   :  { %825 = vmatmul.bf16.gmra.mxu3 %v223_v32  ;;  %v1546_v34 = vpop.f32.mrf.mxu2  ;;  %v147_v32 = vld [vmem:[#allocation2 + $0x278] sm:$0xff] }
  0xd4   :  { %v1550_v36 = vpop.f32.mrf.mxu1 }
  0xd5   :  { %v1548_v35 = vpop.f32.mrf.mxu3 }
  0xda   :  { %v1552_v44 = vpop.f32.mrf.mxu2 }
  0xdc   :  { %v1556_v48 = vpop.f32.mrf.mxu1 }
  0xdd   :  { %v1554_v45 = vpop.f32.mrf.mxu3 }
  0xdf   :  { %652 = vmatmul.bf16.gmra.mxu1 %v225_v46  ;;  %741 = vmatmul.bf16.gmra.mxu2 %v226_v47  ;;  %v235_v46 = vpack.c.bf16 %v147_v32, %v143_v30  ;;  %v540_v32 = vadd.f32 %v1571_v8, %v539_v60 }
  0xe2   :  { %830 = vmatmul.bf16.gmra.mxu3 %v227_v49  ;;  %v1558_v52 = vpop.f32.mrf.mxu2 }
  0xe4   :  { %v1562_v54 = vpop.f32.mrf.mxu1 }
  0xe5   :  { %v1560_v53 = vpop.f32.mrf.mxu3 }
  0xea   :  { %v1564_v63 = vpop.f32.mrf.mxu2 }
  0xec   :  { %v618_v6 = vpop.f32.mrf.mxu1 }
  0xed   :  { %v1566_v3 = vpop.f32.mrf.mxu3  ;;  %v619_v15 = vadd.f32 %v618_v6, %v530_v9  ;;  %v153_v6 = vld [vmem:[#allocation2 + $0x2a8] sm:$0xff]  ;;  %v154_v9 = vld [vmem:[#allocation2 + $0x2b0] sm:$0xff] }
  0xef   :  { %657 = vmatmul.bf16.gmra.mxu1 %v229_v4  ;;  %746 = vmatmul.bf16.gmra.mxu2 %v230_v5  ;;  %v149_v5 = vld [vmem:[#allocation2 + $0x288] sm:$0xff] }
  0xf0   :  { %v237_v23 = vpack.c.bf16 %v153_v6, %v149_v5 }
  0xf2   :  { %835 = vmatmul.bf16.gmra.mxu3 %v231_v7  ;;  %v707_v12 = vpop.f32.mrf.mxu2  ;;  %v150_v7 = vld [vmem:[#allocation2 + $0x290] sm:$0xff] }
  0xf3   :  { %v708_v22 = vadd.f32 %v707_v12, %v619_v15  ;;  %v155_v15 = vld [vmem:[#allocation2 + $0x2b8] sm:$0xff]  ;;  %v238_v24 = vpack.c.bf16 %v154_v9, %v150_v7 }
  0xf4   :  { %v620_v20 = vpop.f32.mrf.mxu1  ;;  %v239_v26 = vpack.c.bf16 %v155_v15, %v151_v13 }
  0xf5   :  { %v796_v16 = vpop.f32.mrf.mxu3  ;;  %v621_v29 = vadd.f32 %v620_v20, %v532_v21 }
  0xf6   :  { %v797_v37 = vadd.f32 %v796_v16, %v708_v22 }
  0xf8   :  { %v876_v49 = vmax.f32 %v797_v37, 0.0  ;;  %v541_v37 = vpop.f32.mrf.mxu0 }
  0xf9   :  { %v542_v43 = vadd.f32 %v1571_v8, %v541_v37  ;;  %v170_v37 = vld [vmem:[#allocation2 + $0x330] sm:$0xff] }
  0xfa   :  { %v709_v33 = vpop.f32.mrf.mxu2 }
  0xfb   :  { %v710_v38 = vadd.f32 %v709_v33, %v621_v29 }
  0xfc   :  { %v623_v42 = vpop.f32.mrf.mxu1 }
  0xfd   :  { %v798_v39 = vpop.f32.mrf.mxu3  ;;  %v624_v57 = vadd.f32 %v623_v42, %v535_v50  ;;  %v158_v50 = vld [vmem:[#allocation2 + $0x2d0] sm:$0xff] }
  0xfe   :  { %v799_v47 = vadd.f32 %v798_v39, %v710_v38 }
  0xff   :  { %662 = vmatmul.bf16.gmra.mxu1 %v233_v40  ;;  %751 = vmatmul.bf16.gmra.mxu2 %v234_v41 }
 0x100   :  { %v877_v51 = vmax.f32 %v799_v47, 0.0  ;;  %v157_v47 = vld [vmem:[#allocation2 + $0x2c8] sm:$0xff] }
 0x102   :  { %840 = vmatmul.bf16.gmra.mxu3 %v235_v46  ;;  %v908_v55 = vpack.c.bf16 %v877_v51, %v876_v49  ;;  %v712_v56 = vpop.f32.mrf.mxu2  ;;  %v161_v49 = vld [vmem:[#allocation2 + $0x2e8] sm:$0xff]  ;;  %v162_v51 = vld [vmem:[#allocation2 + $0x2f0] sm:$0xff] }
 0x103   :  { %v713_v4 = vadd.f32 %v712_v56, %v624_v57  ;;  %v159_v56 = vld [vmem:[#allocation2 + $0x2d8] sm:$0xff]  ;;  %v241_v5 = vpack.c.bf16 %v161_v49, %v157_v47  ;;  %v242_v6 = vpack.c.bf16 %v162_v51, %v158_v50 }
 0x104   :  { %1000 = vmatmul.bf16.vlgmr.msrb.gmra.mxu0 %v908_v55  ;;  %v625_v59 = vpop.f32.mrf.mxu1  ;;  %v163_v57 = vld [vmem:[#allocation2 + $0x2f8] sm:$0xff] }
 0x105   :  { %v801_v58 = vpop.f32.mrf.mxu3  ;;  %v626_v12 = vadd.f32 %v625_v59, %v537_v62  ;;  %v243_v9 = vpack.c.bf16 %v163_v57, %v159_v56 }
 0x106   :  { %v802_v20 = vadd.f32 %v801_v58, %v713_v4  ;;  %v544_v58 = vpop.f32.mrf.mxu0 }
 0x107   :  { %v545_v15 = vadd.f32 %v1571_v8, %v544_v58 }
 0x108   :  { %v878_v30 = vmax.f32 %v802_v20, 0.0 }
 0x10a   :  { %v714_v16 = vpop.f32.mrf.mxu2 }
 0x10b   :  { %v715_v21 = vadd.f32 %v714_v16, %v626_v12 }
 0x10c   :  { %v628_v25 = vpop.f32.mrf.mxu1 }
 0x10d   :  { %v803_v22 = vpop.f32.mrf.mxu3  ;;  %v629_v40 = vadd.f32 %v628_v25, %v540_v32  ;;  %v169_v32 = vld [vmem:[#allocation2 + $0x328] sm:$0xff] }
 0x10e   :  { %v804_v29 = vadd.f32 %v803_v22, %v715_v21 }
 0x10f   :  { %667 = vmatmul.bf16.gmra.mxu1 %v237_v23  ;;  %756 = vmatmul.bf16.gmra.mxu2 %v238_v24  ;;  %v546_v24 = vpop.f32.mrf.mxu0 }
 0x110   :  { %v879_v33 = vmax.f32 %v804_v29, 0.0 }
 0x112   :  { %845 = vmatmul.bf16.gmra.mxu3 %v239_v26  ;;  %v909_v38 = vpack.c.bf16 %v879_v33, %v878_v30  ;;  %v717_v39 = vpop.f32.mrf.mxu2  ;;  %v547_v26 = vadd.f32 %v1571_v8, %v546_v24  ;;  %v165_v30 = vld [vmem:[#allocation2 + $0x308] sm:$0xff]  ;;  %v166_v33 = vld [vmem:[#allocation2 + $0x310] sm:$0xff] }
 0x113   :  { %v718_v46 = vadd.f32 %v717_v39, %v629_v40  ;;  %v167_v39 = vld [vmem:[#allocation2 + $0x318] sm:$0xff]  ;;  %v245_v47 = vpack.c.bf16 %v169_v32, %v165_v30  ;;  %v246_v49 = vpack.c.bf16 %v170_v37, %v166_v33 }
 0x114   :  { %1005 = vmatmul.bf16.gmra.mxu0 %v909_v38  ;;  %v630_v42 = vpop.f32.mrf.mxu1  ;;  %v171_v40 = vld [vmem:[#allocation2 + $0x338] sm:$0xff] }
 0x115   :  { %v806_v41 = vpop.f32.mrf.mxu3  ;;  %v631_v55 = vadd.f32 %v630_v42, %v542_v43  ;;  %v247_v51 = vpack.c.bf16 %v171_v40, %v167_v39  ;;  %v555_v39 = vadd.f32 %v1571_v8, %v1532_v14 }
 0x116   :  { %v807_v60 = vadd.f32 %v806_v41, %v718_v46 }
 0x118   :  { %v880_v13 = vmax.f32 %v807_v60, 0.0  ;;  %v550_v60 = vadd.f32 %v1571_v8, %v1520_v61 }
 0x11a   :  { %v719_v59 = vpop.f32.mrf.mxu2 }
 0x11b   :  { %v720_v62 = vadd.f32 %v719_v59, %v631_v55 }
 0x11c   :  { %v633_v7 = vpop.f32.mrf.mxu1 }
 0x11d   :  { %v808_v4 = vpop.f32.mrf.mxu3  ;;  %v634_v22 = vadd.f32 %v633_v7, %v545_v15  ;;  %v178_v15 = vld [vmem:[#allocation2 + $0x370] sm:$0xff] }
 0x11e   :  { %v809_v12 = vadd.f32 %v808_v4, %v720_v62 }
 0x11f   :  { %672 = vmatmul.bf16.gmra.mxu1 %v241_v5  ;;  %761 = vmatmul.bf16.gmra.mxu2 %v242_v6  ;;  %v552_v6 = vadd.f32 %v1571_v8, %v1526_v2 }
 0x120   :  { %v881_v16 = vmax.f32 %v809_v12, 0.0  ;;  %v177_v12 = vld [vmem:[#allocation2 + $0x368] sm:$0xff] }
 0x122   :  { %850 = vmatmul.bf16.gmra.mxu3 %v243_v9  ;;  %v910_v20 = vpack.c.bf16 %v881_v16, %v880_v13  ;;  %v722_v21 = vpop.f32.mrf.mxu2  ;;  %v173_v9 = vld [vmem:[#allocation2 + $0x348] sm:$0xff]  ;;  %v174_v13 = vld [vmem:[#allocation2 + $0x350] sm:$0xff] }
 0x123   :  { %v723_v29 = vadd.f32 %v722_v21, %v634_v22  ;;  %v179_v21 = vld [vmem:[#allocation2 + $0x378] sm:$0xff]  ;;  %v249_v61 = vpack.c.bf16 %v177_v12, %v173_v9 }
 0x124   :  { %1010 = vmatmul.bf16.gmra.mxu0 %v910_v20  ;;  %v635_v25 = vpop.f32.mrf.mxu1  ;;  %v175_v20 = vld [vmem:[#allocation2 + $0x358] sm:$0xff] }
 0x125   :  { %v811_v23 = vpop.f32.mrf.mxu3  ;;  %v636_v38 = vadd.f32 %v635_v25, %v547_v26  ;;  %v250_v26 = vpack.c.bf16 %v178_v15, %v174_v13  ;;  %v251_v30 = vpack.c.bf16 %v179_v21, %v175_v20  ;;  %v560_v15 = vadd.f32 %v1571_v8, %v1544_v31 }
 0x126   :  { %v812_v42 = vadd.f32 %v811_v23, %v723_v29 }
 0x128   :  { %v882_v56 = vmax.f32 %v812_v42, 0.0 }
 0x12a   :  { %v724_v41 = vpop.f32.mrf.mxu2 }
 0x12b   :  { %v725_v43 = vadd.f32 %v724_v41, %v636_v38 }
 0x12c   :  { %v638_v50 = vpop.f32.mrf.mxu1 }
 0x12d   :  { %v813_v46 = vpop.f32.mrf.mxu3  ;;  %v639_v5 = vadd.f32 %v638_v50, %v550_v60  ;;  %v182_v50 = vld [vmem:[#allocation2 + $0x390] sm:$0xff] }
 0x12e   :  { %v814_v55 = vadd.f32 %v813_v46, %v725_v43  ;;  %v557_v43 = vadd.f32 %v1571_v8, %v1538_v19 }
 0x12f   :  { %677 = vmatmul.bf16.gmra.mxu1 %v245_v47  ;;  %766 = vmatmul.bf16.gmra.mxu2 %v246_v49  ;;  %v181_v47 = vld [vmem:[#allocation2 + $0x388] sm:$0xff] }
 0x130   :  { %v883_v57 = vmax.f32 %v814_v55, 0.0  ;;  %v185_v49 = vld [vmem:[#allocation2 + $0x3a8] sm:$0xff] }
 0x131   :  { %v253_v14 = vpack.c.bf16 %v185_v49, %v181_v47  ;;  %v565_v49 = vadd.f32 %v1571_v8, %v1556_v48  ;;  %v570_v48 = vadd.f32 %v1571_v8, %v1522_v0 }
 0x132   :  { %855 = vmatmul.bf16.gmra.mxu3 %v247_v51  ;;  %v911_v58 = vpack.c.bf16 %v883_v57, %v882_v56  ;;  %v727_v59 = vpop.f32.mrf.mxu2  ;;  %v186_v51 = vld [vmem:[#allocation2 + $0x3b0] sm:$0xff]  ;;  %v183_v56 = vld [vmem:[#allocation2 + $0x398] sm:$0xff] }
 0x133   :  { %v728_v7 = vadd.f32 %v727_v59, %v639_v5  ;;  %v187_v57 = vld [vmem:[#allocation2 + $0x3b8] sm:$0xff] }
 0x134   :  { %1015 = vmatmul.bf16.gmra.mxu0 %v911_v58  ;;  %v640_v4 = vpop.f32.mrf.mxu1 }
 0x135   :  { %v816_v62 = vpop.f32.mrf.mxu3  ;;  %v641_v16 = vadd.f32 %v640_v4, %v552_v6  ;;  %v254_v4 = vpack.c.bf16 %v186_v51, %v182_v50  ;;  %v255_v6 = vpack.c.bf16 %v187_v57, %v183_v56  ;;  %v567_v56 = vadd.f32 %v1571_v8, %v1562_v54 }
 0x136   :  { %v817_v23 = vadd.f32 %v816_v62, %v728_v7  ;;  %v572_v54 = vadd.f32 %v1571_v8, %v1528_v10 }
 0x138   :  { %v884_v33 = vmax.f32 %v817_v23, 0.0 }
 0x13a   :  { %v729_v22 = vpop.f32.mrf.mxu2 }
 0x13b   :  { %v730_v24 = vadd.f32 %v729_v22, %v641_v16  ;;  %v562_v22 = vadd.f32 %v1571_v8, %v1550_v36 }
 0x13c   :  { %v643_v29 = vpop.f32.mrf.mxu1 }
 0x13d   :  { %v818_v25 = vpop.f32.mrf.mxu3  ;;  %v644_v42 = vadd.f32 %v643_v29, %v555_v39 }
 0x13e   :  { %v819_v32 = vadd.f32 %v818_v25, %v730_v24  ;;  %v189_v24 = vld [vmem:[#allocation2 + $0x3c8] sm:$0xff] }
 0x13f   :  { %682 = vmatmul.bf16.gmra.mxu1 %v249_v61  ;;  %771 = vmatmul.bf16.gmra.mxu2 %v250_v26  ;;  %v193_v25 = vld [vmem:[#allocation2 + $0x3e8] sm:$0xff]  ;;  %v190_v61 = vld [vmem:[#allocation2 + $0x3d0] sm:$0xff] }
 0x140   :  { %v885_v37 = vmax.f32 %v819_v32, 0.0  ;;  %v194_v26 = vld [vmem:[#allocation2 + $0x3f0] sm:$0xff]  ;;  %v195_v32 = vld [vmem:[#allocation2 + $0x3f8] sm:$0xff]  ;;  %v257_v31 = vpack.c.bf16 %v193_v25, %v189_v24 }
 0x141   :  { %v258_v39 = vpack.c.bf16 %v194_v26, %v190_v61  ;;  %v1604_v26 = vld [vmem:[%s1673_s4] ss:$0 sm:$0xff]  ;;  %s1478_s4 = smov [#allocation8]  }
 0x142   :  { %860 = vmatmul.bf16.gmra.mxu3 %v251_v30  ;;  %v912_v2 = vpack.c.bf16 %v885_v37, %v884_v33  ;;  %v732_v38 = vpop.f32.mrf.mxu2  ;;  %v191_v30 = vld [vmem:[#allocation2 + $0x3d8] sm:$0xff]  ;;  %s1117_s12 = sshll.u32 %s1478_s4, 4  ;;  %s1118_s12 = int_to_ptr.vmem [resolvable:$true] %s1117_s12 }
 0x143   :  { %v733_v46 = vadd.f32 %v732_v38, %v644_v42 }
 0x144   :  { %1020 = vmatmul.bf16.gmra.mxu0 %v912_v2  ;;  %v645_v41 = vpop.f32.mrf.mxu1 }
 0x145   :  { %v821_v40 = vpop.f32.mrf.mxu3  ;;  %v646_v55 = vadd.f32 %v645_v41, %v557_v43  ;;  %v259_v41 = vpack.c.bf16 %v195_v32, %v191_v30 }
 0x146   :  { %v822_v59 = vadd.f32 %v821_v40, %v733_v46 }
 0x148   :  { %v886_v9 = vmax.f32 %v822_v59, 0.0 }
 0x14a   :  { %v734_v58 = vpop.f32.mrf.mxu2 }
 0x14b   :  { %v735_v60 = vadd.f32 %v734_v58, %v646_v55 }
 0x14c   :  { %v648_v5 = vpop.f32.mrf.mxu1 }
 0x14d   :  { %v823_v62 = vpop.f32.mrf.mxu3  ;;  %v649_v21 = vadd.f32 %v648_v5, %v560_v15 }
 0x14e   :  { %v824_v7 = vadd.f32 %v823_v62, %v735_v60 }
 0x14f   :  { %687 = vmatmul.bf16.gmra.mxu1 %v253_v14  ;;  %776 = vmatmul.bf16.gmra.mxu2 %v254_v4 }
 0x150   :  { %v887_v12 = vmax.f32 %v824_v7, 0.0 }
 0x152   :  { %865 = vmatmul.bf16.gmra.mxu3 %v255_v6  ;;  %v913_v19 = vpack.c.bf16 %v887_v12, %v886_v9  ;;  %v737_v13 = vpop.f32.mrf.mxu2 }
 0x153   :  { %v738_v23 = vadd.f32 %v737_v13, %v649_v21 }
 0x154   :  { %1025 = vmatmul.bf16.gmra.mxu0 %v913_v19  ;;  %v650_v20 = vpop.f32.mrf.mxu1 }
 0x155   :  { %v826_v16 = vpop.f32.mrf.mxu3  ;;  %v651_v29 = vadd.f32 %v650_v20, %v562_v22 }
 0x156   :  { %v827_v37 = vadd.f32 %v826_v16, %v738_v23 }
 0x158   :  { %v888_v43 = vmax.f32 %v827_v37, 0.0  ;;  %v575_v37 = vadd.f32 %v1571_v8, %v1534_v17 }
 0x15a   :  { %v739_v33 = vpop.f32.mrf.mxu2 }
 0x15b   :  { %v740_v2 = vadd.f32 %v739_v33, %v651_v29 }
 0x15c   :  { %v653_v40 = vpop.f32.mrf.mxu1 }
 0x15d   :  { %v828_v38 = vpop.f32.mrf.mxu3  ;;  %v654_v55 = vadd.f32 %v653_v40, %v565_v49 }
 0x15e   :  { %v829_v42 = vadd.f32 %v828_v38, %v740_v2 }
 0x15f   :  { %692 = vmatmul.bf16.gmra.mxu1 %v257_v31  ;;  %781 = vmatmul.bf16.gmra.mxu2 %v258_v39  ;;  %v577_v39 = vadd.f32 %v1571_v8, %v1540_v27  ;;  %v580_v27 = vadd.f32 %v1571_v8, %v1546_v34 }
 0x160   :  { %v889_v46 = vmax.f32 %v829_v42, 0.0 }
 0x162   :  { %870 = vmatmul.bf16.gmra.mxu3 %v259_v41  ;;  %v914_v36 = vpack.c.bf16 %v889_v46, %v888_v43  ;;  %v742_v47 = vpop.f32.mrf.mxu2 }
 0x163   :  { %v743_v57 = vadd.f32 %v742_v47, %v654_v55 }
 0x164   :  { %1030 = vmatmul.bf16.gmra.mxu0 %v914_v36  ;;  %v655_v51 = vpop.f32.mrf.mxu1 }
 0x165   :  { %v831_v50 = vpop.f32.mrf.mxu3  ;;  %v656_v58 = vadd.f32 %v655_v51, %v567_v56 }
 0x166   :  { %v832_v60 = vadd.f32 %v831_v50, %v743_v57 }
 0x168   :  { %v890_v6 = vmax.f32 %v832_v60, 0.0 }
 0x16a   :  { %v744_v59 = vpop.f32.mrf.mxu2 }
 0x16b   :  { %v745_v62 = vadd.f32 %v744_v59, %v656_v58 }
 0x16c   :  { %v658_v4 = vpop.f32.mrf.mxu1 }
 0x16d   :  { %v833_v14 = vpop.f32.mrf.mxu3  ;;  %v659_v15 = vadd.f32 %v658_v4, %v570_v48  ;;  %v582_v4 = vadd.f32 %v1571_v8, %v1552_v44  ;;  %v585_v44 = vadd.f32 %v1571_v8, %v1558_v52 }
 0x16e   :  { %v834_v5 = vadd.f32 %v833_v14, %v745_v62 }
 0x170   :  { %v891_v7 = vmax.f32 %v834_v5, 0.0 }
 0x172   :  { %v915_v9 = vpack.c.bf16 %v891_v7, %v890_v6  ;;  %v747_v12 = vpop.f32.mrf.mxu2 }
 0x173   :  { %v748_v16 = vadd.f32 %v747_v12, %v659_v15 }
 0x174   :  { %1035 = vmatmul.bf16.gmra.mxu0 %v915_v9  ;;  %v660_v13 = vpop.f32.mrf.mxu1 }
 0x175   :  { %v836_v19 = vpop.f32.mrf.mxu3  ;;  %v661_v20 = vadd.f32 %v660_v13, %v572_v54 }
 0x176   :  { %v837_v22 = vadd.f32 %v836_v19, %v748_v16 }
 0x178   :  { %v892_v0 = vmax.f32 %v837_v22, 0.0 }
 0x17a   :  { %v749_v21 = vpop.f32.mrf.mxu2 }
 0x17b   :  { %v750_v23 = vadd.f32 %v749_v21, %v661_v20 }
 0x17c   :  { %v663_v25 = vpop.f32.mrf.mxu1 }
 0x17d   :  { %v838_v24 = vpop.f32.mrf.mxu3  ;;  %v664_v31 = vadd.f32 %v663_v25, %v575_v37 }
 0x17e   :  { %v839_v61 = vadd.f32 %v838_v24, %v750_v23 }
 0x180   :  { %v893_v29 = vmax.f32 %v839_v61, 0.0 }
 0x181   :  { %v1001_v30 = vpop.f32.mrf.mxu0 }
 0x182   :  { %v916_v32 = vpack.c.bf16 %v893_v29, %v892_v0  ;;  %v1002_v33 = vadd.f32 %v1604_v26, %v1001_v30  ;;  %v752_v10 = vpop.f32.mrf.mxu2  ;;  %v587_v0 = vadd.f32 %v1571_v8, %v1564_v63  ;;  %v590_v63 = vadd.f32 %v1571_v8, %v1524_v1 }
 0x183   :  { %v753_v40 = vadd.f32 %v752_v10, %v664_v31 }
 0x184   :  { %1081 = vst [vmem:[#allocation8] sm:$0xff] %v1002_v33  ;;  %1040 = vmatmul.bf16.gmra.mxu0 %v916_v32  ;;  %v665_v38 = vpop.f32.mrf.mxu1 }
 0x185   :  { %v841_v2 = vpop.f32.mrf.mxu3  ;;  %v666_v42 = vadd.f32 %v665_v38, %v577_v39 }
 0x186   :  { %v842_v36 = vadd.f32 %v841_v2, %v753_v40 }
 0x188   :  { %v894_v51 = vmax.f32 %v842_v36, 0.0 }
 0x189   :  { %v1003_v41 = vpop.f32.mrf.mxu0 }
 0x18a   :  { %v1004_v43 = vadd.f32 %v1604_v26, %v1003_v41  ;;  %v754_v46 = vpop.f32.mrf.mxu2 }
 0x18b   :  { %v755_v47 = vadd.f32 %v754_v46, %v666_v42 }
 0x18c   :  { %1082 = vst [vmem:[#allocation8 + $0x8] sm:$0xff] %v1004_v43  ;;  %v668_v50 = vpop.f32.mrf.mxu1 }
 0x18d   :  { %v843_v49 = vpop.f32.mrf.mxu3  ;;  %v669_v14 = vadd.f32 %v668_v50, %v580_v27  ;;  %v592_v50 = vadd.f32 %v1571_v8, %v1530_v11  ;;  %v595_v11 = vadd.f32 %v1571_v8, %v1536_v18 }
 0x18e   :  { %v844_v17 = vadd.f32 %v843_v49, %v755_v47 }
 0x190   :  { %v895_v55 = vmax.f32 %v844_v17, 0.0 }
 0x191   :  { %v1006_v56 = vpop.f32.mrf.mxu0 }
 0x192   :  { %v917_v57 = vpack.c.bf16 %v895_v55, %v894_v51  ;;  %v1007_v58 = vadd.f32 %v1604_v26, %v1006_v56  ;;  %v757_v59 = vpop.f32.mrf.mxu2 }
 0x193   :  { %v758_v5 = vadd.f32 %v757_v59, %v669_v14 }
 0x194   :  { %1083 = vst [vmem:[#allocation8 + $0x10] sm:$0xff] %v1007_v58  ;;  %1045 = vmatmul.bf16.gmra.mxu0 %v917_v57  ;;  %v670_v62 = vpop.f32.mrf.mxu1 }
 0x195   :  { %v846_v60 = vpop.f32.mrf.mxu3  ;;  %v671_v7 = vadd.f32 %v670_v62, %v582_v4 }
 0x196   :  { %v847_v48 = vadd.f32 %v846_v60, %v758_v5 }
 0x198   :  { %v896_v54 = vmax.f32 %v847_v48, 0.0 }
 0x199   :  { %v1008_v6 = vpop.f32.mrf.mxu0 }
 0x19a   :  { %v1009_v9 = vadd.f32 %v1604_v26, %v1008_v6  ;;  %v759_v12 = vpop.f32.mrf.mxu2 }
 0x19b   :  { %v760_v19 = vadd.f32 %v759_v12, %v671_v7 }
 0x19c   :  { %1084 = vst [vmem:[#allocation8 + $0x18] sm:$0xff] %v1009_v9  ;;  %v673_v15 = vpop.f32.mrf.mxu1 }
 0x19d   :  { %v848_v13 = vpop.f32.mrf.mxu3  ;;  %v674_v61 = vadd.f32 %v673_v15, %v585_v44 }
 0x19e   :  { %v849_v34 = vadd.f32 %v848_v13, %v760_v19  ;;  %v597_v19 = vadd.f32 %v1571_v8, %v1542_v28  ;;  %v600_v28 = vadd.f32 %v1571_v8, %v1548_v35 }
 0x1a0   :  { %v897_v16 = vmax.f32 %v849_v34, 0.0 }
 0x1a1   :  { %v1011_v20 = vpop.f32.mrf.mxu0 }
 0x1a2   :  { %v918_v21 = vpack.c.bf16 %v897_v16, %v896_v54  ;;  %v1012_v22 = vadd.f32 %v1604_v26, %v1011_v20  ;;  %v762_v23 = vpop.f32.mrf.mxu2 }
 0x1a3   :  { %v763_v29 = vadd.f32 %v762_v23, %v674_v61 }
 0x1a4   :  { %1085 = vst [vmem:[#allocation8 + $0x20] sm:$0xff] %v1012_v22  ;;  %1050 = vmatmul.bf16.gmra.mxu0 %v918_v21  ;;  %v675_v25 = vpop.f32.mrf.mxu1 }
 0x1a5   :  { %v851_v24 = vpop.f32.mrf.mxu3  ;;  %v676_v32 = vadd.f32 %v675_v25, %v587_v0 }
 0x1a6   :  { %v852_v37 = vadd.f32 %v851_v24, %v763_v29 }
 0x1a8   :  { %v898_v39 = vmax.f32 %v852_v37, 0.0 }
 0x1a9   :  { %v1013_v30 = vpop.f32.mrf.mxu0 }
 0x1aa   :  { %v1014_v33 = vadd.f32 %v1604_v26, %v1013_v30  ;;  %v764_v10 = vpop.f32.mrf.mxu2 }
 0x1ab   :  { %v765_v2 = vadd.f32 %v764_v10, %v676_v32  ;;  %v602_v10 = vadd.f32 %v1571_v8, %v1554_v45  ;;  %v605_v45 = vadd.f32 %v1571_v8, %v1560_v53 }
 0x1ac   :  { %1086 = vst [vmem:[#allocation8 + $0x28] sm:$0xff] %v1014_v33  ;;  %v678_v31 = vpop.f32.mrf.mxu1 }
 0x1ad   :  { %v853_v38 = vpop.f32.mrf.mxu3  ;;  %v679_v49 = vadd.f32 %v678_v31, %v590_v63 }
 0x1ae   :  { %v854_v52 = vadd.f32 %v853_v38, %v765_v2 }
 0x1b0   :  { %v899_v40 = vmax.f32 %v854_v52, 0.0 }
 0x1b1   :  { %v1016_v41 = vpop.f32.mrf.mxu0 }
 0x1b2   :  { %v919_v42 = vpack.c.bf16 %v899_v40, %v898_v39  ;;  %v1017_v43 = vadd.f32 %v1604_v26, %v1016_v41  ;;  %v767_v46 = vpop.f32.mrf.mxu2 }
 0x1b3   :  { %v768_v17 = vadd.f32 %v767_v46, %v679_v49 }
 0x1b4   :  { %1087 = vst [vmem:[#allocation8 + $0x30] sm:$0xff] %v1017_v43  ;;  %1055 = vmatmul.bf16.gmra.mxu0 %v919_v42  ;;  %v680_v47 = vpop.f32.mrf.mxu1 }
 0x1b5   :  { %v856_v36 = vpop.f32.mrf.mxu3  ;;  %v681_v55 = vadd.f32 %v680_v47, %v592_v50 }
 0x1b6   :  { %v857_v58 = vadd.f32 %v856_v36, %v768_v17 }
 0x1b8   :  { %v900_v62 = vmax.f32 %v857_v58, 0.0 }
 0x1b9   :  { %v1018_v51 = vpop.f32.mrf.mxu0 }
 0x1ba   :  { %v1019_v56 = vadd.f32 %v1604_v26, %v1018_v51  ;;  %v769_v57 = vpop.f32.mrf.mxu2 }
 0x1bb   :  { %v770_v59 = vadd.f32 %v769_v57, %v681_v55  ;;  %v607_v55 = vadd.f32 %v1571_v8, %v1566_v3 }
 0x1bc   :  { %1088 = vst [vmem:[#allocation8 + $0x38] sm:$0xff] %v1019_v56  ;;  %v683_v60 = vpop.f32.mrf.mxu1 }
 0x1bd   :  { %v858_v27 = vpop.f32.mrf.mxu3  ;;  %v684_v48 = vadd.f32 %v683_v60, %v595_v11 }
 0x1be   :  { %v859_v1 = vadd.f32 %v858_v27, %v770_v59 }
 0x1c0   :  { %v901_v14 = vmax.f32 %v859_v1, 0.0 }
 0x1c1   :  { %v1021_v4 = vpop.f32.mrf.mxu0 }
 0x1c2   :  { %v920_v5 = vpack.c.bf16 %v901_v14, %v900_v62  ;;  %v1022_v6 = vadd.f32 %v1604_v26, %v1021_v4  ;;  %v772_v7 = vpop.f32.mrf.mxu2 }
 0x1c3   :  { %v773_v13 = vadd.f32 %v772_v7, %v684_v48 }
 0x1c4   :  { %1089 = vst [vmem:[#allocation8 + $0x40] sm:$0xff] %v1022_v6  ;;  %1060 = vmatmul.bf16.gmra.mxu0 %v920_v5  ;;  %v685_v12 = vpop.f32.mrf.mxu1 }
 0x1c5   :  { %v861_v9 = vpop.f32.mrf.mxu3  ;;  %v686_v34 = vadd.f32 %v685_v12, %v597_v19 }
 0x1c6   :  { %v862_v20 = vadd.f32 %v861_v9, %v773_v13 }
 0x1c8   :  { %v902_v44 = vmax.f32 %v862_v20, 0.0 }
 0x1c9   :  { %v1023_v15 = vpop.f32.mrf.mxu0 }
 0x1ca   :  { %v1024_v54 = vadd.f32 %v1604_v26, %v1023_v15  ;;  %v774_v16 = vpop.f32.mrf.mxu2 }
 0x1cb   :  { %v775_v21 = vadd.f32 %v774_v16, %v686_v34 }
 0x1cc   :  { %1090 = vst [vmem:[#allocation8 + $0x48] sm:$0xff] %v1024_v54  ;;  %v688_v23 = vpop.f32.mrf.mxu1 }
 0x1cd   :  { %v863_v22 = vpop.f32.mrf.mxu3  ;;  %v689_v33 = vadd.f32 %v688_v23, %v600_v28 }
 0x1ce   :  { %v864_v18 = vadd.f32 %v863_v22, %v775_v21 }
 0x1d0   :  { %v903_v24 = vmax.f32 %v864_v18, 0.0 }
 0x1d1   :  { %v1026_v25 = vpop.f32.mrf.mxu0 }
 0x1d2   :  { %v921_v61 = vpack.c.bf16 %v903_v24, %v902_v44  ;;  %v1027_v0 = vadd.f32 %v1604_v26, %v1026_v25  ;;  %v777_v29 = vpop.f32.mrf.mxu2 }
 0x1d3   :  { %v778_v37 = vadd.f32 %v777_v29, %v689_v33 }
 0x1d4   :  { %1091 = vst [vmem:[#allocation8 + $0x50] sm:$0xff] %v1027_v0  ;;  %1065 = vmatmul.bf16.gmra.mxu0 %v921_v61  ;;  %v690_v32 = vpop.f32.mrf.mxu1 }
 0x1d5   :  { %v866_v30 = vpop.f32.mrf.mxu3  ;;  %v691_v38 = vadd.f32 %v690_v32, %v602_v10 }
 0x1d6   :  { %v867_v39 = vadd.f32 %v866_v30, %v778_v37 }
 0x1d8   :  { %v904_v43 = vmax.f32 %v867_v39, 0.0 }
 0x1d9   :  { %v1028_v2 = vpop.f32.mrf.mxu0 }
 0x1da   :  { %v1029_v31 = vadd.f32 %v1604_v26, %v1028_v2  ;;  %v779_v52 = vpop.f32.mrf.mxu2 }
 0x1db   :  { %v780_v40 = vadd.f32 %v779_v52, %v691_v38 }
 0x1dc   :  { %1092 = vst [vmem:[#allocation8 + $0x58] sm:$0xff] %v1029_v31  ;;  %v693_v42 = vpop.f32.mrf.mxu1 }
 0x1dd   :  { %v868_v41 = vpop.f32.mrf.mxu3  ;;  %v694_v17 = vadd.f32 %v693_v42, %v605_v45 }
 0x1de   :  { %v869_v35 = vadd.f32 %v868_v41, %v780_v40 }
 0x1e0   :  { %v905_v46 = vmax.f32 %v869_v35, 0.0 }
 0x1e1   :  { %v1031_v63 = vpop.f32.mrf.mxu0 }
 0x1e2   :  { %v922_v36 = vpack.c.bf16 %v905_v46, %v904_v43  ;;  %v1032_v47 = vadd.f32 %v1604_v26, %v1031_v63  ;;  %v782_v49 = vpop.f32.mrf.mxu2 }
 0x1e3   :  { %v783_v56 = vadd.f32 %v782_v49, %v694_v17 }
 0x1e4   :  { %1093 = vst [vmem:[#allocation8 + $0x60] sm:$0xff] %v1032_v47  ;;  %1070 = vmatmul.bf16.gmra.mxu0 %v922_v36  ;;  %v695_v51 = vpop.f32.mrf.mxu1 }
 0x1e5   :  { %v871_v50 = vpop.f32.mrf.mxu3  ;;  %v696_v58 = vadd.f32 %v695_v51, %v607_v55 }
 0x1e6   :  { %v872_v60 = vadd.f32 %v871_v50, %v783_v56 }
 0x1e8   :  { %v906_v53 = vmax.f32 %v872_v60, 0.0 }
 0x1e9   :  { %v1033_v57 = vpop.f32.mrf.mxu0 }
 0x1ea   :  { %v1034_v59 = vadd.f32 %v1604_v26, %v1033_v57  ;;  %v784_v27 = vpop.f32.mrf.mxu2 }
 0x1eb   :  { %v785_v1 = vadd.f32 %v784_v27, %v696_v58 }
 0x1ec   :  { %1094 = vst [vmem:[#allocation8 + $0x68] sm:$0xff] %v1034_v59 }
 0x1ed   :  { %v873_v62 = vpop.f32.mrf.mxu3 }
 0x1ee   :  { %v874_v14 = vadd.f32 %v873_v62, %v785_v1 }
 0x1f0   :  { %v907_v4 = vmax.f32 %v874_v14, 0.0 }
 0x1f1   :  { %v1036_v5 = vpop.f32.mrf.mxu0 }
 0x1f2   :  { %v923_v6 = vpack.c.bf16 %v907_v4, %v906_v53  ;;  %v1037_v7 = vadd.f32 %v1604_v26, %v1036_v5 }
 0x1f4   :  { %1095 = vst [vmem:[#allocation8 + $0x70] sm:$0xff] %v1037_v7  ;;  %1075 = vmatmul.bf16.gmra.mxu0 %v923_v6 }
 0x1f9   :  { %v1038_v3 = vpop.f32.mrf.mxu0 }
 0x1fa   :  { %v1039_v8 = vadd.f32 %v1604_v26, %v1038_v3 }
 0x1fc   :  { %1096 = vst [vmem:[#allocation8 + $0x78] sm:$0xff] %v1039_v8 }
 0x201   :  { %v1041_v11 = vpop.f32.mrf.mxu0 }
 0x202   :  { %v1042_v9 = vadd.f32 %v1604_v26, %v1041_v11 }
 0x204   :  { %1097 = vst [vmem:[#allocation8 + $0x80] sm:$0xff] %v1042_v9 }
 0x209   :  { %v1043_v12 = vpop.f32.mrf.mxu0 }
 0x20a   :  { %v1044_v48 = vadd.f32 %v1604_v26, %v1043_v12 }
 0x20c   :  { %1098 = vst [vmem:[#allocation8 + $0x88] sm:$0xff] %v1044_v48 }
 0x211   :  { %v1046_v19 = vpop.f32.mrf.mxu0 }
 0x212   :  { %v1047_v13 = vadd.f32 %v1604_v26, %v1046_v19 }
 0x214   :  { %1099 = vst [vmem:[#allocation8 + $0x90] sm:$0xff] %v1047_v13 }
 0x219   :  { %v1048_v15 = vpop.f32.mrf.mxu0 }
 0x21a   :  { %v1049_v34 = vadd.f32 %v1604_v26, %v1048_v15 }
 0x21c   :  { %1100 = vst [vmem:[#allocation8 + $0x98] sm:$0xff] %v1049_v34 }
 0x221   :  { %v1051_v54 = vpop.f32.mrf.mxu0 }
 0x222   :  { %v1052_v16 = vadd.f32 %v1604_v26, %v1051_v54 }
 0x224   :  { %1101 = vst [vmem:[#allocation8 + $0xa0] sm:$0xff] %v1052_v16 }
 0x229   :  { %v1053_v20 = vpop.f32.mrf.mxu0 }
 0x22a   :  { %v1054_v21 = vadd.f32 %v1604_v26, %v1053_v20 }
 0x22c   :  { %1102 = vst [vmem:[#allocation8 + $0xa8] sm:$0xff] %v1054_v21 }
 0x231   :  { %v1056_v22 = vpop.f32.mrf.mxu0 }
 0x232   :  { %v1057_v23 = vadd.f32 %v1604_v26, %v1056_v22 }
 0x234   :  { %1103 = vst [vmem:[#allocation8 + $0xb0] sm:$0xff] %v1057_v23 }
 0x239   :  { %v1058_v18 = vpop.f32.mrf.mxu0 }
 0x23a   :  { %v1059_v44 = vadd.f32 %v1604_v26, %v1058_v18 }
 0x23c   :  { %1104 = vst [vmem:[#allocation8 + $0xb8] sm:$0xff] %v1059_v44 }
 0x241   :  { %v1061_v24 = vpop.f32.mrf.mxu0 }
 0x242   :  { %v1062_v25 = vadd.f32 %v1604_v26, %v1061_v24 }
 0x244   :  { %1105 = vst [vmem:[#allocation8 + $0xc0] sm:$0xff] %v1062_v25 }
 0x249   :  { %v1063_v61 = vpop.f32.mrf.mxu0 }
 0x24a   :  { %v1064_v0 = vadd.f32 %v1604_v26, %v1063_v61 }
 0x24c   :  { %1106 = vst [vmem:[#allocation8 + $0xc8] sm:$0xff] %v1064_v0 }
 0x251   :  { %v1066_v29 = vpop.f32.mrf.mxu0 }
 0x252   :  { %v1067_v28 = vadd.f32 %v1604_v26, %v1066_v29 }
 0x254   :  { %1107 = vst [vmem:[#allocation8 + $0xd0] sm:$0xff] %v1067_v28 }
 0x259   :  { %v1068_v30 = vpop.f32.mrf.mxu0 }
 0x25a   :  { %v1069_v32 = vadd.f32 %v1604_v26, %v1068_v30 }
 0x25c   :  { %1108 = vst [vmem:[#allocation8 + $0xd8] sm:$0xff] %v1069_v32 }
 0x261   :  { %v1071_v33 = vpop.f32.mrf.mxu0 }
 0x262   :  { %v1072_v10 = vadd.f32 %v1604_v26, %v1071_v33 }
 0x264   :  { %1109 = vst [vmem:[#allocation8 + $0xe0] sm:$0xff] %v1072_v10 }
 0x269   :  { %v1073_v37 = vpop.f32.mrf.mxu0 }
 0x26a   :  { %v1074_v2 = vadd.f32 %v1604_v26, %v1073_v37 }
 0x26c   :  { %1110 = vst [vmem:[#allocation8 + $0xe8] sm:$0xff] %v1074_v2 }
 0x271   :  { %v1076_v38 = vpop.f32.mrf.mxu0 }
 0x272   :  { %v1077_v31 = vadd.f32 %v1604_v26, %v1076_v38 }
 0x274   :  { %1111 = vst [vmem:[#allocation8 + $0xf0] sm:$0xff] %v1077_v31 }
 0x279   :  { %v1078_v52 = vpop.f32.mrf.mxu0 }
 0x27a   :  { %v1079_v39 = vadd.f32 %v1604_v26, %v1078_v52 }
 0x27c   :  { %1112 = vst [vmem:[#allocation8 + $0xf8] sm:$0xff] %v1079_v39 }
 0x27d   :  { %1125 = dma.vmem_to_hbm [thread:$0]  %s1118_s12, 4096, %s1120_s15, [#allocation4], %s1479_s16, %s1479_s16, %s1480_s17  }
 0x27e   :  { %1469 = dma.done.wait [#allocation4], 4096  }
 0x27f   :  { %1470 = vsyncadd [#allocation4], 4294963200 }
 0x280   :  { %1130 = vsyncpa [#allocation3], 1 }
 0x281   :  { %1131 = vsyncpa [#allocation6], 1 }
 0x282   :  { %1132 = vsyncpa [#allocation4], 1 }

// kernel: tpu_custom_call.1
= control target key start
LH: loop header
LB: loop body
LE: loop exit
PB: predicated region body
PF: predicated region fallthrough
CT: control target
= control target key end

     0   :  { %10 = vsyncpa [#allocation3], 0  ;;  %s1669_s0 = inlined_call_operand.hbm [shape: f32[256,512], index: 0, kind: input, shape index: {}]   ;;  %s1670_s1 = inlined_call_operand.hbm [shape: bf16[512,128], index: 1, kind: input, shape index: {}]   ;;  %s1671_s2 = inlined_call_operand.vmem [shape: f32[1,128], index: 2, kind: input, shape index: {}]   ;;  %s1672_s3 = inlined_call_operand.hbm [shape: bf16[128,128], index: 3, kind: input, shape index: {}]   ;;  %s1673_s4 = inlined_call_operand.vmem [shape: f32[1,128], index: 4, kind: input, shape index: {}]   ;;  %s1674_s5 = inlined_call_operand.hbm [shape: f32[256,128], index: 5, kind: output, shape index: {}]  }
   0x1   :  { %11 = vsyncpa [#allocation6], 0  ;;  %s30_s20 = sshll.u32 %s1670_s1, 4  ;;  %s31_s20 = int_to_ptr.hbm [resolvable:$true] %s30_s20 }
   0x2   :  { %12 = vsyncpa [#allocation4], 0  ;;  %s1471_s21 = smov [#allocation5]   ;;  %s17_s25 = sshll.u32 %s1669_s0, 4  ;;  %s18_s25 = int_to_ptr.hbm [resolvable:$true] %s17_s25 }
   0x3   :  { %s32_s22 = sshll.u32 %s1471_s21, 4  ;;  %s1472_s26 = smov 64   ;;  %s33_s22 = int_to_ptr.vmem [resolvable:$true] %s32_s22 }
   0x4   :  { %s1473_s27 = smov 4   ;;  %s1474_s28 = smov [#allocation2]  }
   0x5   :  { %38 = dma.hbm_to_vmem [thread:$0]  %s31_s20, 4096, %s33_s22, [#allocation6], %s1472_s26, %s1472_s26, %s1473_s27  }
   0x6   :  { %s19_s29 = sshll.u32 %s1474_s28, 4  ;;  %s1475_s30 = smov 512   ;;  %s20_s29 = int_to_ptr.vmem [resolvable:$true] %s19_s29 }
   0x7   :  { %s1476_s6 = smov 32   ;;  %s45_s8 = sshll.u32 %s1672_s3, 4  ;;  %s46_s8 = int_to_ptr.hbm [resolvable:$true] %s45_s8 }
   0x8   :  { %25 = dma.hbm_to_vmem [thread:$0]  %s18_s25, 16384, %s20_s29, [#allocation3], %s1475_s30, %s1475_s30, %s1476_s6  }
   0x9   :  { %s1477_s9 = smov [#allocation7]  }
   0xa   :  { %s47_s10 = sshll.u32 %s1477_s9, 4  ;;  %s48_s10 = int_to_ptr.vmem [resolvable:$true] %s47_s10 }
   0xb   :  { %53 = dma.hbm_to_vmem [thread:$0]  %s46_s8, 1024, %s48_s10, [#allocation6], %s1472_s26, %s1472_s26, %s1473_s27  }
   0xc   :  { %1465 = dma.done.wait [#allocation3], 16384  }
   0xd   :  { %1466 = vsyncadd [#allocation3], 4294950912 }
   0xe   :  { %1467 = dma.done.wait [#allocation6], 5120  }
   0xf   :  { %1468 = vsyncadd [#allocation6], 4294962176  ;;  %v1300_v0 = vld [vmem:[#allocation5 + $0x38] sm:$0xff]  ;;  %v1299_v1 = vld [vmem:[#allocation5 + $0x30] sm:$0xff]  ;;  %s1119_s15 = sshll.u32 %s1674_s5, 4  ;;  %s1479_s16 = smov 128   ;;  %s1120_s15 = int_to_ptr.hbm [resolvable:$true] %s1119_s15 }
  0x10   :  { %1333 = vmatpush.bf16.msra.mxu1 %v1300_v0  ;;  %1334 = vmatpush.bf16.msra.mxu2 %v1300_v0  ;;  %v1298_v2 = vld [vmem:[#allocation5 + $0x28] sm:$0xff]  ;;  %v1297_v3 = vld [vmem:[#allocation5 + $0x20] sm:$0xff]  ;;  %v1296_v4 = vld [vmem:[#allocation5 + $0x18] sm:$0xff]  ;;  %s1480_s17 = smov 8  }
  0x11   :  { %1335 = vmatpush.bf16.msra.mxu3 %v1300_v0  ;;  %520 = vmatpush.bf16.msra.mxu0 %v1300_v0  ;;  %v1295_v5 = vld [vmem:[#allocation5 + $0x10] sm:$0xff]  ;;  %v1294_v6 = vld [vmem:[#allocation5 + $0x8] sm:$0xff]  ;;  %v1293_v7 = vld [vmem:[#allocation5] sm:$0xff] }
  0x12   :  { %v100_v8 = vld [vmem:[#allocation2 + $0x100] sm:$0xff]  ;;  %v1316_v14 = vld [vmem:[#allocation5 + $0xb8] sm:$0xff]  ;;  %v1315_v20 = vld [vmem:[#allocation5 + $0xb0] sm:$0xff] }
  0x13   :  { %v104_v9 = vld [vmem:[#allocation2 + $0x120] sm:$0xff]  ;;  %v1324_v15 = vld [vmem:[#allocation5 + $0xf8] sm:$0xff]  ;;  %v1323_v21 = vld [vmem:[#allocation5 + $0xf0] sm:$0xff] }
  0x14   :  { %1336 = vmatpush.bf16.msra.mxu1 %v1299_v1  ;;  %1337 = vmatpush.bf16.msra.mxu2 %v1299_v1  ;;  %v132_v10 = vld [vmem:[#allocation2 + $0x200] sm:$0xff]  ;;  %v1308_v16 = vld [vmem:[#allocation5 + $0x78] sm:$0xff]  ;;  %v212_v17 = vpack.c.bf16 %v104_v9, %v100_v8  ;;  %v1307_v22 = vld [vmem:[#allocation5 + $0x70] sm:$0xff] }
  0x15   :  { %1338 = vmatpush.bf16.msra.mxu3 %v1299_v1  ;;  %521 = vmatpush.bf16.msra.mxu0 %v1299_v1  ;;  %v136_v11 = vld [vmem:[#allocation2 + $0x220] sm:$0xff]  ;;  %v1314_v23 = vld [vmem:[#allocation5 + $0xa8] sm:$0xff]  ;;  %v1312_v35 = vld [vmem:[#allocation5 + $0x98] sm:$0xff] }
  0x16   :  { %v164_v12 = vld [vmem:[#allocation2 + $0x300] sm:$0xff]  ;;  %v228_v18 = vpack.c.bf16 %v136_v11, %v132_v10  ;;  %v1322_v24 = vld [vmem:[#allocation5 + $0xe8] sm:$0xff]  ;;  %v1320_v36 = vld [vmem:[#allocation5 + $0xd8] sm:$0xff] }
  0x17   :  { %v168_v13 = vld [vmem:[#allocation2 + $0x320] sm:$0xff]  ;;  %v1306_v25 = vld [vmem:[#allocation5 + $0x68] sm:$0xff]  ;;  %v1304_v37 = vld [vmem:[#allocation5 + $0x58] sm:$0xff] }
  0x18   :  { %1339 = vmatpush.bf16.msra.mxu1 %v1298_v2  ;;  %1340 = vmatpush.bf16.msra.mxu2 %v1298_v2  ;;  %v244_v19 = vpack.c.bf16 %v168_v13, %v164_v12  ;;  %v1313_v26 = vld [vmem:[#allocation5 + $0xa0] sm:$0xff]  ;;  %v1311_v41 = vld [vmem:[#allocation5 + $0x90] sm:$0xff]  ;;  %v1310_v44 = vld [vmem:[#allocation5 + $0x88] sm:$0xff] }
  0x19   :  { %1341 = vmatpush.bf16.msra.mxu3 %v1298_v2  ;;  %522 = vmatpush.bf16.msra.mxu0 %v1298_v2  ;;  %v1321_v27 = vld [vmem:[#allocation5 + $0xe0] sm:$0xff]  ;;  %v1319_v42 = vld [vmem:[#allocation5 + $0xd0] sm:$0xff]  ;;  %v1318_v47 = vld [vmem:[#allocation5 + $0xc8] sm:$0xff] }
  0x1a   :  { %v1305_v28 = vld [vmem:[#allocation5 + $0x60] sm:$0xff]  ;;  %v1303_v43 = vld [vmem:[#allocation5 + $0x50] sm:$0xff]  ;;  %v1302_v48 = vld [vmem:[#allocation5 + $0x48] sm:$0xff] }
  0x1b   :  { %v108_v29 = vld [vmem:[#allocation2 + $0x140] sm:$0xff]  ;;  %v69_v13 = vld [vmem:[#allocation2 + $0x8] sm:$0xff] }
  0x1c   :  { %1342 = vmatpush.bf16.msra.mxu1 %v1297_v3  ;;  %1343 = vmatpush.bf16.msra.mxu2 %v1297_v3  ;;  %v112_v30 = vld [vmem:[#allocation2 + $0x160] sm:$0xff] }
  0x1d   :  { %1344 = vmatpush.bf16.msra.mxu3 %v1297_v3  ;;  %523 = vmatpush.bf16.msra.mxu0 %v1297_v3  ;;  %v140_v31 = vld [vmem:[#allocation2 + $0x240] sm:$0xff]  ;;  %v216_v38 = vpack.c.bf16 %v112_v30, %v108_v29  ;;  %v79_v29 = vld [vmem:[#allocation2 + $0x58] sm:$0xff] }
  0x1e   :  { %v144_v32 = vld [vmem:[#allocation2 + $0x260] sm:$0xff]  ;;  %v83_v30 = vld [vmem:[#allocation2 + $0x78] sm:$0xff] }
  0x1f   :  { %v172_v33 = vld [vmem:[#allocation2 + $0x340] sm:$0xff]  ;;  %v232_v39 = vpack.c.bf16 %v144_v32, %v140_v31 }
  0x20   :  { %1345 = vmatpush.bf16.msra.mxu1 %v1296_v4  ;;  %1346 = vmatpush.bf16.msra.mxu2 %v1296_v4  ;;  %v176_v34 = vld [vmem:[#allocation2 + $0x360] sm:$0xff] }
  0x21   :  { %1347 = vmatpush.bf16.msra.mxu3 %v1296_v4  ;;  %524 = vmatpush.bf16.msra.mxu0 %v1296_v4  ;;  %v248_v40 = vpack.c.bf16 %v176_v34, %v172_v33  ;;  %v68_v45 = vld [vmem:[#allocation2] sm:$0xff]  ;;  %v203_v33 = vpack.c.bf16 %v83_v30, %v79_v29  ;;  %v85_v34 = vld [vmem:[#allocation2 + $0x88] sm:$0xff] }
  0x22   :  { %v72_v46 = vld [vmem:[#allocation2 + $0x20] sm:$0xff] }
  0x23   :  { %v196_v49 = vpack.c.bf16 %v72_v46, %v68_v45  ;;  %v1309_v50 = vld [vmem:[#allocation5 + $0x80] sm:$0xff]  ;;  %v94_v45 = vld [vmem:[#allocation2 + $0xd0] sm:$0xff] }
  0x24   :  { %1348 = vmatpush.bf16.msra.mxu1 %v1295_v5  ;;  %1349 = vmatpush.bf16.msra.mxu2 %v1295_v5  ;;  %v1317_v51 = vld [vmem:[#allocation5 + $0xc0] sm:$0xff]  ;;  %v98_v46 = vld [vmem:[#allocation2 + $0xf0] sm:$0xff] }
  0x25   :  { %1350 = vmatpush.bf16.msra.mxu3 %v1295_v5  ;;  %525 = vmatpush.bf16.msra.mxu0 %v1295_v5  ;;  %v1301_v52 = vld [vmem:[#allocation5 + $0x40] sm:$0xff] }
  0x26   :  { %v116_v53 = vld [vmem:[#allocation2 + $0x180] sm:$0xff] }
  0x27   :  { %v120_v54 = vld [vmem:[#allocation2 + $0x1a0] sm:$0xff] }
  0x28   :  { %1351 = vmatpush.bf16.msra.mxu1 %v1294_v6  ;;  %1352 = vmatpush.bf16.msra.mxu2 %v1294_v6  ;;  %v148_v55 = vld [vmem:[#allocation2 + $0x280] sm:$0xff]  ;;  %v220_v59 = vpack.c.bf16 %v120_v54, %v116_v53  ;;  %v101_v53 = vld [vmem:[#allocation2 + $0x108] sm:$0xff] }
  0x29   :  { %1353 = vmatpush.bf16.msra.mxu3 %v1294_v6  ;;  %526 = vmatpush.bf16.msra.mxu0 %v1294_v6  ;;  %v152_v56 = vld [vmem:[#allocation2 + $0x2a0] sm:$0xff]  ;;  %v105_v54 = vld [vmem:[#allocation2 + $0x128] sm:$0xff] }
  0x2a   :  { %v180_v57 = vld [vmem:[#allocation2 + $0x380] sm:$0xff]  ;;  %v236_v60 = vpack.c.bf16 %v152_v56, %v148_v55  ;;  %v102_v55 = vld [vmem:[#allocation2 + $0x110] sm:$0xff] }
  0x2b   :  { %v184_v58 = vld [vmem:[#allocation2 + $0x3a0] sm:$0xff]  ;;  %v106_v56 = vld [vmem:[#allocation2 + $0x130] sm:$0xff] }
  0x2c   :  { %1354 = vmatpush.bf16.msra.mxu1 %v1293_v7  ;;  %1355 = vmatpush.bf16.msra.mxu2 %v1293_v7  ;;  %v252_v61 = vpack.c.bf16 %v184_v58, %v180_v57  ;;  %v76_v62 = vld [vmem:[#allocation2 + $0x40] sm:$0xff]  ;;  %v103_v57 = vld [vmem:[#allocation2 + $0x118] sm:$0xff] }
  0x2d   :  { %1356 = vmatpush.bf16.msra.mxu3 %v1293_v7  ;;  %527 = vmatpush.bf16.msra.mxu0 %v1293_v7  ;;  %v80_v63 = vld [vmem:[#allocation2 + $0x60] sm:$0xff]  ;;  %v107_v58 = vld [vmem:[#allocation2 + $0x138] sm:$0xff] }
  0x2e   :  { %v200_v0 = vpack.c.bf16 %v80_v63, %v76_v62  ;;  %v124_v1 = vld [vmem:[#allocation2 + $0x1c0] sm:$0xff]  ;;  %v215_v62 = vpack.c.bf16 %v107_v58, %v103_v57  ;;  %v1331_v63 = vld [vmem:[#allocation7 + $0x30] sm:$0xff]  ;;  %v137_v57 = vld [vmem:[#allocation2 + $0x228] sm:$0xff] }
  0x2f   :  { %548 = vmatmul.bf16.vlgmr.msra.gmra.mxu1 %v212_v17  ;;  %568 = vmatmul.bf16.vlgmr.msra.gmra.mxu2 %v228_v18  ;;  %v128_v2 = vld [vmem:[#allocation2 + $0x1e0] sm:$0xff]  ;;  %v71_v17 = vld [vmem:[#allocation2 + $0x18] sm:$0xff]  ;;  %v134_v58 = vld [vmem:[#allocation2 + $0x210] sm:$0xff] }
  0x30   :  { %698 = vmatpush.bf16.msrb.mxu2 %v1316_v14  ;;  %609 = vmatpush.bf16.msrb.mxu1 %v1308_v16  ;;  %v156_v3 = vld [vmem:[#allocation2 + $0x2c0] sm:$0xff]  ;;  %v224_v7 = vpack.c.bf16 %v128_v2, %v124_v1  ;;  %v73_v14 = vld [vmem:[#allocation2 + $0x28] sm:$0xff]  ;;  %v74_v16 = vld [vmem:[#allocation2 + $0x30] sm:$0xff] }
  0x31   :  { %787 = vmatpush.bf16.msrb.mxu3 %v1324_v15  ;;  %528 = vmatmul.bf16.vlgmr.msra.gmra.mxu0 %v196_v49  ;;  %v160_v4 = vld [vmem:[#allocation2 + $0x2e0] sm:$0xff]  ;;  %v70_v15 = vld [vmem:[#allocation2 + $0x10] sm:$0xff]  ;;  %v75_v18 = vld [vmem:[#allocation2 + $0x38] sm:$0xff] }
  0x32   :  { %588 = vmatmul.bf16.vlgmr.msra.gmra.mxu3 %v244_v19  ;;  %v188_v5 = vld [vmem:[#allocation2 + $0x3c0] sm:$0xff]  ;;  %v240_v8 = vpack.c.bf16 %v160_v4, %v156_v3  ;;  %v197_v19 = vpack.c.bf16 %v73_v14, %v69_v13  ;;  %v1330_v3 = vld [vmem:[#allocation7 + $0x28] sm:$0xff] }
  0x33   :  { %v192_v6 = vld [vmem:[#allocation2 + $0x3e0] sm:$0xff]  ;;  %v109_v4 = vld [vmem:[#allocation2 + $0x148] sm:$0xff] }
  0x34   :  { %699 = vmatpush.bf16.msrb.mxu2 %v1315_v20  ;;  %610 = vmatpush.bf16.msrb.mxu1 %v1307_v22  ;;  %v256_v9 = vpack.c.bf16 %v192_v6, %v188_v5  ;;  %v84_v10 = vld [vmem:[#allocation2 + $0x80] sm:$0xff]  ;;  %v198_v20 = vpack.c.bf16 %v74_v16, %v70_v15  ;;  %v113_v5 = vld [vmem:[#allocation2 + $0x168] sm:$0xff]  ;;  %v110_v6 = vld [vmem:[#allocation2 + $0x150] sm:$0xff] }
  0x35   :  { %788 = vmatpush.bf16.msrb.mxu3 %v1323_v21  ;;  %v88_v11 = vld [vmem:[#allocation2 + $0xa0] sm:$0xff]  ;;  %v199_v21 = vpack.c.bf16 %v75_v18, %v71_v17 }
  0x36   :  { %v204_v12 = vpack.c.bf16 %v88_v11, %v84_v10  ;;  %v92_v22 = vld [vmem:[#allocation2 + $0xc0] sm:$0xff] }
  0x37   :  { %v1329_v16 = vld [vmem:[#allocation7 + $0x20] sm:$0xff] }
  0x38   :  { %700 = vmatpush.bf16.msrb.mxu2 %v1314_v23  ;;  %611 = vmatpush.bf16.msrb.mxu1 %v1306_v25  ;;  %v96_v23 = vld [vmem:[#allocation2 + $0xe0] sm:$0xff]  ;;  %v77_v25 = vld [vmem:[#allocation2 + $0x48] sm:$0xff] }
  0x39   :  { %789 = vmatpush.bf16.msrb.mxu3 %v1322_v24  ;;  %v208_v24 = vpack.c.bf16 %v96_v23, %v92_v22  ;;  %v121_v22 = vld [vmem:[#allocation2 + $0x1a8] sm:$0xff]  ;;  %v118_v23 = vld [vmem:[#allocation2 + $0x190] sm:$0xff] }
  0x3c   :  { %701 = vmatpush.bf16.msrb.mxu2 %v1313_v26  ;;  %612 = vmatpush.bf16.msrb.mxu1 %v1305_v28  ;;  %v81_v26 = vld [vmem:[#allocation2 + $0x68] sm:$0xff]  ;;  %v82_v28 = vld [vmem:[#allocation2 + $0x70] sm:$0xff] }
  0x3d   :  { %790 = vmatpush.bf16.msrb.mxu3 %v1321_v27  ;;  %v78_v27 = vld [vmem:[#allocation2 + $0x50] sm:$0xff]  ;;  %v201_v31 = vpack.c.bf16 %v81_v26, %v77_v25  ;;  %v119_v25 = vld [vmem:[#allocation2 + $0x198] sm:$0xff] }
  0x3e   :  { %v202_v32 = vpack.c.bf16 %v82_v28, %v78_v27  ;;  %v123_v26 = vld [vmem:[#allocation2 + $0x1b8] sm:$0xff] }
  0x3f   :  { %553 = vmatmul.bf16.gmra.mxu1 %v216_v38  ;;  %573 = vmatmul.bf16.gmra.mxu2 %v232_v39  ;;  %v87_v38 = vld [vmem:[#allocation2 + $0x98] sm:$0xff] }
  0x40   :  { %702 = vmatpush.bf16.msrb.mxu2 %v1312_v35  ;;  %613 = vmatpush.bf16.msrb.mxu1 %v1304_v37  ;;  %v89_v35 = vld [vmem:[#allocation2 + $0xa8] sm:$0xff]  ;;  %v90_v37 = vld [vmem:[#allocation2 + $0xb0] sm:$0xff]  ;;  %v91_v39 = vld [vmem:[#allocation2 + $0xb8] sm:$0xff] }
  0x41   :  { %791 = vmatpush.bf16.msrb.mxu3 %v1320_v36  ;;  %533 = vmatmul.bf16.gmra.mxu0 %v200_v0  ;;  %v86_v36 = vld [vmem:[#allocation2 + $0x90] sm:$0xff] }
  0x42   :  { %593 = vmatmul.bf16.gmra.mxu3 %v248_v40  ;;  %v205_v40 = vpack.c.bf16 %v89_v35, %v85_v34 }
  0x44   :  { %703 = vmatpush.bf16.msrb.mxu2 %v1311_v41  ;;  %614 = vmatpush.bf16.msrb.mxu1 %v1303_v43  ;;  %v206_v41 = vpack.c.bf16 %v90_v37, %v86_v36  ;;  %v93_v43 = vld [vmem:[#allocation2 + $0xc8] sm:$0xff] }
  0x45   :  { %792 = vmatpush.bf16.msrb.mxu3 %v1319_v42  ;;  %v207_v42 = vpack.c.bf16 %v91_v39, %v87_v38  ;;  %v125_v37 = vld [vmem:[#allocation2 + $0x1c8] sm:$0xff] }
  0x46   :  { %v1326_v38 = vld [vmem:[#allocation7 + $0x8] sm:$0xff] }
  0x47   :  { %v129_v39 = vld [vmem:[#allocation2 + $0x1e8] sm:$0xff] }
  0x48   :  { %704 = vmatpush.bf16.msrb.mxu2 %v1310_v44  ;;  %615 = vmatpush.bf16.msrb.mxu1 %v1302_v48  ;;  %v97_v44 = vld [vmem:[#allocation2 + $0xe8] sm:$0xff]  ;;  %v99_v48 = vld [vmem:[#allocation2 + $0xf8] sm:$0xff] }
  0x49   :  { %793 = vmatpush.bf16.msrb.mxu3 %v1318_v47  ;;  %v95_v47 = vld [vmem:[#allocation2 + $0xd8] sm:$0xff]  ;;  %v209_v49 = vpack.c.bf16 %v97_v44, %v93_v43 }
  0x4a   :  { %v131_v43 = vld [vmem:[#allocation2 + $0x1f8] sm:$0xff] }
  0x4c   :  { %705 = vmatpush.bf16.msrb.mxu2 %v1309_v50  ;;  %616 = vmatpush.bf16.msrb.mxu1 %v1301_v52  ;;  %v210_v50 = vpack.c.bf16 %v98_v46, %v94_v45  ;;  %v1332_v52 = vld [vmem:[#allocation7 + $0x38] sm:$0xff]  ;;  %v225_v46 = vpack.c.bf16 %v129_v39, %v125_v37 }
  0x4d   :  { %794 = vmatpush.bf16.msrb.mxu3 %v1317_v51  ;;  %v211_v51 = vpack.c.bf16 %v99_v48, %v95_v47  ;;  %992 = vmatpush.bf16.msrb.mxu0 %v1332_v52 }
  0x4f   :  { %558 = vmatmul.bf16.gmra.mxu1 %v220_v59  ;;  %578 = vmatmul.bf16.gmra.mxu2 %v236_v60  ;;  %v213_v59 = vpack.c.bf16 %v105_v54, %v101_v53  ;;  %v214_v60 = vpack.c.bf16 %v106_v56, %v102_v55  ;;  %v133_v55 = vld [vmem:[#allocation2 + $0x208] sm:$0xff] }
  0x51   :  { %538 = vmatmul.bf16.gmra.mxu0 %v204_v12  ;;  %v217_v12 = vpack.c.bf16 %v113_v5, %v109_v4  ;;  %v229_v4 = vpack.c.bf16 %v137_v57, %v133_v55 }
  0x52   :  { %598 = vmatmul.bf16.gmra.mxu3 %v252_v61  ;;  %993 = vmatpush.bf16.msrb.mxu0 %v1331_v63 }
  0x56   :  { %994 = vmatpush.bf16.msrb.mxu0 %v1330_v3 }
  0x5a   :  { %995 = vmatpush.bf16.msrb.mxu0 %v1329_v16 }
  0x5f   :  { %563 = vmatmul.bf16.gmra.mxu1 %v224_v7  ;;  %583 = vmatmul.bf16.gmra.mxu2 %v240_v8  ;;  %v114_v7 = vld [vmem:[#allocation2 + $0x170] sm:$0xff]  ;;  %v111_v8 = vld [vmem:[#allocation2 + $0x158] sm:$0xff] }
  0x60   :  { %v218_v13 = vpack.c.bf16 %v114_v7, %v110_v6 }
  0x61   :  { %543 = vmatmul.bf16.gmra.mxu0 %v208_v24  ;;  %v122_v24 = vld [vmem:[#allocation2 + $0x1b0] sm:$0xff] }
  0x62   :  { %603 = vmatmul.bf16.gmra.mxu3 %v256_v9  ;;  %v115_v9 = vld [vmem:[#allocation2 + $0x178] sm:$0xff]  ;;  %v222_v30 = vpack.c.bf16 %v122_v24, %v118_v23  ;;  %v141_v23 = vld [vmem:[#allocation2 + $0x248] sm:$0xff] }
  0x63   :  { %v219_v15 = vpack.c.bf16 %v115_v9, %v111_v8  ;;  %v1571_v8 = vld [vmem:[%s1671_s2] ss:$0 sm:$0xff]  ;;  %v145_v24 = vld [vmem:[#allocation2 + $0x268] sm:$0xff] }
  0x6f   :  { %617 = vmatmul.bf16.vlgmr.msrb.gmra.mxu1 %v197_v19  ;;  %706 = vmatmul.bf16.vlgmr.msrb.gmra.mxu2 %v198_v20  ;;  %v1328_v20 = vld [vmem:[#allocation7 + $0x18] sm:$0xff] }
  0x70   :  { %996 = vmatpush.bf16.msrb.mxu0 %v1328_v20 }
  0x72   :  { %795 = vmatmul.bf16.vlgmr.msrb.gmra.mxu3 %v199_v21  ;;  %v117_v21 = vld [vmem:[#allocation2 + $0x188] sm:$0xff] }
  0x73   :  { %v221_v29 = vpack.c.bf16 %v121_v22, %v117_v21 }
  0x7f   :  { %622 = vmatmul.bf16.gmra.mxu1 %v201_v31  ;;  %711 = vmatmul.bf16.gmra.mxu2 %v202_v32  ;;  %v223_v32 = vpack.c.bf16 %v123_v26, %v119_v25  ;;  %v142_v25 = vld [vmem:[#allocation2 + $0x250] sm:$0xff] }
  0x80   :  { %v146_v26 = vld [vmem:[#allocation2 + $0x270] sm:$0xff] }
  0x82   :  { %800 = vmatmul.bf16.gmra.mxu3 %v203_v33  ;;  %v1327_v33 = vld [vmem:[#allocation7 + $0x10] sm:$0xff] }
  0x83   :  { %997 = vmatpush.bf16.msrb.mxu0 %v1327_v33 }
  0x87   :  { %998 = vmatpush.bf16.msrb.mxu0 %v1326_v38 }
  0x8f   :  { %627 = vmatmul.bf16.gmra.mxu1 %v205_v40  ;;  %716 = vmatmul.bf16.gmra.mxu2 %v206_v41  ;;  %v126_v40 = vld [vmem:[#allocation2 + $0x1d0] sm:$0xff] }
  0x90   :  { %v130_v41 = vld [vmem:[#allocation2 + $0x1f0] sm:$0xff] }
  0x91   :  { %v226_v47 = vpack.c.bf16 %v130_v41, %v126_v40  ;;  %v233_v40 = vpack.c.bf16 %v145_v24, %v141_v23  ;;  %v234_v41 = vpack.c.bf16 %v146_v26, %v142_v25 }
  0x92   :  { %805 = vmatmul.bf16.gmra.mxu3 %v207_v42  ;;  %v127_v42 = vld [vmem:[#allocation2 + $0x1d8] sm:$0xff] }
  0x9f   :  { %632 = vmatmul.bf16.gmra.mxu1 %v209_v49  ;;  %721 = vmatmul.bf16.gmra.mxu2 %v210_v50  ;;  %v227_v49 = vpack.c.bf16 %v131_v43, %v127_v42 }
  0xa2   :  { %810 = vmatmul.bf16.gmra.mxu3 %v211_v51  ;;  %v1325_v51 = vld [vmem:[#allocation7] sm:$0xff] }
  0xa3   :  { %999 = vmatpush.bf16.msrb.mxu0 %v1325_v51 }
  0xac   :  { %v1520_v61 = vpop.f32.mrf.mxu1 }
  0xae   :  { %v529_v50 = vpop.f32.mrf.mxu0 }
  0xaf   :  { %637 = vmatmul.bf16.gmra.mxu1 %v213_v59  ;;  %726 = vmatmul.bf16.gmra.mxu2 %v214_v60  ;;  %v138_v59 = vld [vmem:[#allocation2 + $0x230] sm:$0xff]  ;;  %v135_v60 = vld [vmem:[#allocation2 + $0x218] sm:$0xff]  ;;  %v530_v9 = vadd.f32 %v1571_v8, %v529_v50 }
  0xb0   :  { %v230_v5 = vpack.c.bf16 %v138_v59, %v134_v58 }
  0xb2   :  { %815 = vmatmul.bf16.gmra.mxu3 %v215_v62  ;;  %v1522_v0 = vpop.f32.mrf.mxu2  ;;  %v139_v62 = vld [vmem:[#allocation2 + $0x238] sm:$0xff] }
  0xb3   :  { %v231_v7 = vpack.c.bf16 %v139_v62, %v135_v60 }
  0xb4   :  { %v1526_v2 = vpop.f32.mrf.mxu1 }
  0xb5   :  { %v1524_v1 = vpop.f32.mrf.mxu3 }
  0xb6   :  { %v531_v56 = vpop.f32.mrf.mxu0 }
  0xb7   :  { %v532_v21 = vadd.f32 %v1571_v8, %v531_v56 }
  0xba   :  { %v1528_v10 = vpop.f32.mrf.mxu2 }
  0xbc   :  { %v1532_v14 = vpop.f32.mrf.mxu1 }
  0xbd   :  { %v1530_v11 = vpop.f32.mrf.mxu3 }
  0xbf   :  { %642 = vmatmul.bf16.gmra.mxu1 %v217_v12  ;;  %731 = vmatmul.bf16.gmra.mxu2 %v218_v13  ;;  %v534_v13 = vpop.f32.mrf.mxu0 }
  0xc0   :  { %v535_v50 = vadd.f32 %v1571_v8, %v534_v13  ;;  %v151_v13 = vld [vmem:[#allocation2 + $0x298] sm:$0xff] }
  0xc2   :  { %820 = vmatmul.bf16.gmra.mxu3 %v219_v15  ;;  %v1534_v17 = vpop.f32.mrf.mxu2 }
  0xc4   :  { %v1538_v19 = vpop.f32.mrf.mxu1 }
  0xc5   :  { %v1536_v18 = vpop.f32.mrf.mxu3 }
  0xc7   :  { %v536_v43 = vpop.f32.mrf.mxu0 }
  0xc8   :  { %v537_v62 = vadd.f32 %v1571_v8, %v536_v43 }
  0xca   :  { %v1540_v27 = vpop.f32.mrf.mxu2 }
  0xcc   :  { %v1544_v31 = vpop.f32.mrf.mxu1 }
  0xcd   :  { %v1542_v28 = vpop.f32.mrf.mxu3 }
  0xcf   :  { %647 = vmatmul.bf16.gmra.mxu1 %v221_v29  ;;  %736 = vmatmul.bf16.gmra.mxu2 %v222_v30  ;;  %v143_v30 = vld [vmem:[#allocation2 + $0x258] sm:$0xff]  ;;  %v539_v60 = vpop.f32.mrf.mxu0 }
  0xd2   :  { %825 = vmatmul.bf16.gmra.mxu3 %v223_v32  ;;  %v1546_v34 = vpop.f32.mrf.mxu2  ;;  %v147_v32 = vld [vmem:[#allocation2 + $0x278] sm:$0xff] }
  0xd4   :  { %v1550_v36 = vpop.f32.mrf.mxu1 }
  0xd5   :  { %v1548_v35 = vpop.f32.mrf.mxu3 }
  0xda   :  { %v1552_v44 = vpop.f32.mrf.mxu2 }
  0xdc   :  { %v1556_v48 = vpop.f32.mrf.mxu1 }
  0xdd   :  { %v1554_v45 = vpop.f32.mrf.mxu3 }
  0xdf   :  { %652 = vmatmul.bf16.gmra.mxu1 %v225_v46  ;;  %741 = vmatmul.bf16.gmra.mxu2 %v226_v47  ;;  %v235_v46 = vpack.c.bf16 %v147_v32, %v143_v30  ;;  %v540_v32 = vadd.f32 %v1571_v8, %v539_v60 }
  0xe2   :  { %830 = vmatmul.bf16.gmra.mxu3 %v227_v49  ;;  %v1558_v52 = vpop.f32.mrf.mxu2 }
  0xe4   :  { %v1562_v54 = vpop.f32.mrf.mxu1 }
  0xe5   :  { %v1560_v53 = vpop.f32.mrf.mxu3 }
  0xea   :  { %v1564_v63 = vpop.f32.mrf.mxu2 }
  0xec   :  { %v618_v6 = vpop.f32.mrf.mxu1 }
  0xed   :  { %v1566_v3 = vpop.f32.mrf.mxu3  ;;  %v619_v15 = vadd.f32 %v618_v6, %v530_v9  ;;  %v153_v6 = vld [vmem:[#allocation2 + $0x2a8] sm:$0xff]  ;;  %v154_v9 = vld [vmem:[#allocation2 + $0x2b0] sm:$0xff] }
  0xef   :  { %657 = vmatmul.bf16.gmra.mxu1 %v229_v4  ;;  %746 = vmatmul.bf16.gmra.mxu2 %v230_v5  ;;  %v149_v5 = vld [vmem:[#allocation2 + $0x288] sm:$0xff] }
  0xf0   :  { %v237_v23 = vpack.c.bf16 %v153_v6, %v149_v5 }
  0xf2   :  { %835 = vmatmul.bf16.gmra.mxu3 %v231_v7  ;;  %v707_v12 = vpop.f32.mrf.mxu2  ;;  %v150_v7 = vld [vmem:[#allocation2 + $0x290] sm:$0xff] }
  0xf3   :  { %v708_v22 = vadd.f32 %v707_v12, %v619_v15  ;;  %v155_v15 = vld [vmem:[#allocation2 + $0x2b8] sm:$0xff]  ;;  %v238_v24 = vpack.c.bf16 %v154_v9, %v150_v7 }
  0xf4   :  { %v620_v20 = vpop.f32.mrf.mxu1  ;;  %v239_v26 = vpack.c.bf16 %v155_v15, %v151_v13 }
  0xf5   :  { %v796_v16 = vpop.f32.mrf.mxu3  ;;  %v621_v29 = vadd.f32 %v620_v20, %v532_v21 }
  0xf6   :  { %v797_v37 = vadd.f32 %v796_v16, %v708_v22 }
  0xf8   :  { %v876_v49 = vmax.f32 %v797_v37, 0.0  ;;  %v541_v37 = vpop.f32.mrf.mxu0 }
  0xf9   :  { %v542_v43 = vadd.f32 %v1571_v8, %v541_v37  ;;  %v170_v37 = vld [vmem:[#allocation2 + $0x330] sm:$0xff] }
  0xfa   :  { %v709_v33 = vpop.f32.mrf.mxu2 }
  0xfb   :  { %v710_v38 = vadd.f32 %v709_v33, %v621_v29 }
  0xfc   :  { %v623_v42 = vpop.f32.mrf.mxu1 }
  0xfd   :  { %v798_v39 = vpop.f32.mrf.mxu3  ;;  %v624_v57 = vadd.f32 %v623_v42, %v535_v50  ;;  %v158_v50 = vld [vmem:[#allocation2 + $0x2d0] sm:$0xff] }
  0xfe   :  { %v799_v47 = vadd.f32 %v798_v39, %v710_v38 }
  0xff   :  { %662 = vmatmul.bf16.gmra.mxu1 %v233_v40  ;;  %751 = vmatmul.bf16.gmra.mxu2 %v234_v41 }
 0x100   :  { %v877_v51 = vmax.f32 %v799_v47, 0.0  ;;  %v157_v47 = vld [vmem:[#allocation2 + $0x2c8] sm:$0xff] }
 0x102   :  { %840 = vmatmul.bf16.gmra.mxu3 %v235_v46  ;;  %v908_v55 = vpack.c.bf16 %v877_v51, %v876_v49  ;;  %v712_v56 = vpop.f32.mrf.mxu2  ;;  %v161_v49 = vld [vmem:[#allocation2 + $0x2e8] sm:$0xff]  ;;  %v162_v51 = vld [vmem:[#allocation2 + $0x2f0] sm:$0xff] }
 0x103   :  { %v713_v4 = vadd.f32 %v712_v56, %v624_v57  ;;  %v159_v56 = vld [vmem:[#allocation2 + $0x2d8] sm:$0xff]  ;;  %v241_v5 = vpack.c.bf16 %v161_v49, %v157_v47  ;;  %v242_v6 = vpack.c.bf16 %v162_v51, %v158_v50 }
 0x104   :  { %1000 = vmatmul.bf16.vlgmr.msrb.gmra.mxu0 %v908_v55  ;;  %v625_v59 = vpop.f32.mrf.mxu1  ;;  %v163_v57 = vld [vmem:[#allocation2 + $0x2f8] sm:$0xff] }
 0x105   :  { %v801_v58 = vpop.f32.mrf.mxu3  ;;  %v626_v12 = vadd.f32 %v625_v59, %v537_v62  ;;  %v243_v9 = vpack.c.bf16 %v163_v57, %v159_v56 }
 0x106   :  { %v802_v20 = vadd.f32 %v801_v58, %v713_v4  ;;  %v544_v58 = vpop.f32.mrf.mxu0 }
 0x107   :  { %v545_v15 = vadd.f32 %v1571_v8, %v544_v58 }
 0x108   :  { %v878_v30 = vmax.f32 %v802_v20, 0.0 }
 0x10a   :  { %v714_v16 = vpop.f32.mrf.mxu2 }
 0x10b   :  { %v715_v21 = vadd.f32 %v714_v16, %v626_v12 }
 0x10c   :  { %v628_v25 = vpop.f32.mrf.mxu1 }
 0x10d   :  { %v803_v22 = vpop.f32.mrf.mxu3  ;;  %v629_v40 = vadd.f32 %v628_v25, %v540_v32  ;;  %v169_v32 = vld [vmem:[#allocation2 + $0x328] sm:$0xff] }
 0x10e   :  { %v804_v29 = vadd.f32 %v803_v22, %v715_v21 }
 0x10f   :  { %667 = vmatmul.bf16.gmra.mxu1 %v237_v23  ;;  %756 = vmatmul.bf16.gmra.mxu2 %v238_v24  ;;  %v546_v24 = vpop.f32.mrf.mxu0 }
 0x110   :  { %v879_v33 = vmax.f32 %v804_v29, 0.0 }
 0x112   :  { %845 = vmatmul.bf16.gmra.mxu3 %v239_v26  ;;  %v909_v38 = vpack.c.bf16 %v879_v33, %v878_v30  ;;  %v717_v39 = vpop.f32.mrf.mxu2  ;;  %v547_v26 = vadd.f32 %v1571_v8, %v546_v24  ;;  %v165_v30 = vld [vmem:[#allocation2 + $0x308] sm:$0xff]  ;;  %v166_v33 = vld [vmem:[#allocation2 + $0x310] sm:$0xff] }
 0x113   :  { %v718_v46 = vadd.f32 %v717_v39, %v629_v40  ;;  %v167_v39 = vld [vmem:[#allocation2 + $0x318] sm:$0xff]  ;;  %v245_v47 = vpack.c.bf16 %v169_v32, %v165_v30  ;;  %v246_v49 = vpack.c.bf16 %v170_v37, %v166_v33 }
 0x114   :  { %1005 = vmatmul.bf16.gmra.mxu0 %v909_v38  ;;  %v630_v42 = vpop.f32.mrf.mxu1  ;;  %v171_v40 = vld [vmem:[#allocation2 + $0x338] sm:$0xff] }
 0x115   :  { %v806_v41 = vpop.f32.mrf.mxu3  ;;  %v631_v55 = vadd.f32 %v630_v42, %v542_v43  ;;  %v247_v51 = vpack.c.bf16 %v171_v40, %v167_v39  ;;  %v555_v39 = vadd.f32 %v1571_v8, %v1532_v14 }
 0x116   :  { %v807_v60 = vadd.f32 %v806_v41, %v718_v46 }
 0x118   :  { %v880_v13 = vmax.f32 %v807_v60, 0.0  ;;  %v550_v60 = vadd.f32 %v1571_v8, %v1520_v61 }
 0x11a   :  { %v719_v59 = vpop.f32.mrf.mxu2 }
 0x11b   :  { %v720_v62 = vadd.f32 %v719_v59, %v631_v55 }
 0x11c   :  { %v633_v7 = vpop.f32.mrf.mxu1 }
 0x11d   :  { %v808_v4 = vpop.f32.mrf.mxu3  ;;  %v634_v22 = vadd.f32 %v633_v7, %v545_v15  ;;  %v178_v15 = vld [vmem:[#allocation2 + $0x370] sm:$0xff] }
 0x11e   :  { %v809_v12 = vadd.f32 %v808_v4, %v720_v62 }
 0x11f   :  { %672 = vmatmul.bf16.gmra.mxu1 %v241_v5  ;;  %761 = vmatmul.bf16.gmra.mxu2 %v242_v6  ;;  %v552_v6 = vadd.f32 %v1571_v8, %v1526_v2 }
 0x120   :  { %v881_v16 = vmax.f32 %v809_v12, 0.0  ;;  %v177_v12 = vld [vmem:[#allocation2 + $0x368] sm:$0xff] }
 0x122   :  { %850 = vmatmul.bf16.gmra.mxu3 %v243_v9  ;;  %v910_v20 = vpack.c.bf16 %v881_v16, %v880_v13  ;;  %v722_v21 = vpop.f32.mrf.mxu2  ;;  %v173_v9 = vld [vmem:[#allocation2 + $0x348] sm:$0xff]  ;;  %v174_v13 = vld [vmem:[#allocation2 + $0x350] sm:$0xff] }
 0x123   :  { %v723_v29 = vadd.f32 %v722_v21, %v634_v22  ;;  %v179_v21 = vld [vmem:[#allocation2 + $0x378] sm:$0xff]  ;;  %v249_v61 = vpack.c.bf16 %v177_v12, %v173_v9 }
 0x124   :  { %1010 = vmatmul.bf16.gmra.mxu0 %v910_v20  ;;  %v635_v25 = vpop.f32.mrf.mxu1  ;;  %v175_v20 = vld [vmem:[#allocation2 + $0x358] sm:$0xff] }
 0x125   :  { %v811_v23 = vpop.f32.mrf.mxu3  ;;  %v636_v38 = vadd.f32 %v635_v25, %v547_v26  ;;  %v250_v26 = vpack.c.bf16 %v178_v15, %v174_v13  ;;  %v251_v30 = vpack.c.bf16 %v179_v21, %v175_v20  ;;  %v560_v15 = vadd.f32 %v1571_v8, %v1544_v31 }
 0x126   :  { %v812_v42 = vadd.f32 %v811_v23, %v723_v29 }
 0x128   :  { %v882_v56 = vmax.f32 %v812_v42, 0.0 }
 0x12a   :  { %v724_v41 = vpop.f32.mrf.mxu2 }
 0x12b   :  { %v725_v43 = vadd.f32 %v724_v41, %v636_v38 }
 0x12c   :  { %v638_v50 = vpop.f32.mrf.mxu1 }
 0x12d   :  { %v813_v46 = vpop.f32.mrf.mxu3  ;;  %v639_v5 = vadd.f32 %v638_v50, %v550_v60  ;;  %v182_v50 = vld [vmem:[#allocation2 + $0x390] sm:$0xff] }
 0x12e   :  { %v814_v55 = vadd.f32 %v813_v46, %v725_v43  ;;  %v557_v43 = vadd.f32 %v1571_v8, %v1538_v19 }
 0x12f   :  { %677 = vmatmul.bf16.gmra.mxu1 %v245_v47  ;;  %766 = vmatmul.bf16.gmra.mxu2 %v246_v49  ;;  %v181_v47 = vld [vmem:[#allocation2 + $0x388] sm:$0xff] }
 0x130   :  { %v883_v57 = vmax.f32 %v814_v55, 0.0  ;;  %v185_v49 = vld [vmem:[#allocation2 + $0x3a8] sm:$0xff] }
 0x131   :  { %v253_v14 = vpack.c.bf16 %v185_v49, %v181_v47  ;;  %v565_v49 = vadd.f32 %v1571_v8, %v1556_v48  ;;  %v570_v48 = vadd.f32 %v1571_v8, %v1522_v0 }
 0x132   :  { %855 = vmatmul.bf16.gmra.mxu3 %v247_v51  ;;  %v911_v58 = vpack.c.bf16 %v883_v57, %v882_v56  ;;  %v727_v59 = vpop.f32.mrf.mxu2  ;;  %v186_v51 = vld [vmem:[#allocation2 + $0x3b0] sm:$0xff]  ;;  %v183_v56 = vld [vmem:[#allocation2 + $0x398] sm:$0xff] }
 0x133   :  { %v728_v7 = vadd.f32 %v727_v59, %v639_v5  ;;  %v187_v57 = vld [vmem:[#allocation2 + $0x3b8] sm:$0xff] }
 0x134   :  { %1015 = vmatmul.bf16.gmra.mxu0 %v911_v58  ;;  %v640_v4 = vpop.f32.mrf.mxu1 }
 0x135   :  { %v816_v62 = vpop.f32.mrf.mxu3  ;;  %v641_v16 = vadd.f32 %v640_v4, %v552_v6  ;;  %v254_v4 = vpack.c.bf16 %v186_v51, %v182_v50  ;;  %v255_v6 = vpack.c.bf16 %v187_v57, %v183_v56  ;;  %v567_v56 = vadd.f32 %v1571_v8, %v1562_v54 }
 0x136   :  { %v817_v23 = vadd.f32 %v816_v62, %v728_v7  ;;  %v572_v54 = vadd.f32 %v1571_v8, %v1528_v10 }
 0x138   :  { %v884_v33 = vmax.f32 %v817_v23, 0.0 }
 0x13a   :  { %v729_v22 = vpop.f32.mrf.mxu2 }
 0x13b   :  { %v730_v24 = vadd.f32 %v729_v22, %v641_v16  ;;  %v562_v22 = vadd.f32 %v1571_v8, %v1550_v36 }
 0x13c   :  { %v643_v29 = vpop.f32.mrf.mxu1 }
 0x13d   :  { %v818_v25 = vpop.f32.mrf.mxu3  ;;  %v644_v42 = vadd.f32 %v643_v29, %v555_v39 }
 0x13e   :  { %v819_v32 = vadd.f32 %v818_v25, %v730_v24  ;;  %v189_v24 = vld [vmem:[#allocation2 + $0x3c8] sm:$0xff] }
 0x13f   :  { %682 = vmatmul.bf16.gmra.mxu1 %v249_v61  ;;  %771 = vmatmul.bf16.gmra.mxu2 %v250_v26  ;;  %v193_v25 = vld [vmem:[#allocation2 + $0x3e8] sm:$0xff]  ;;  %v190_v61 = vld [vmem:[#allocation2 + $0x3d0] sm:$0xff] }
 0x140   :  { %v885_v37 = vmax.f32 %v819_v32, 0.0  ;;  %v194_v26 = vld [vmem:[#allocation2 + $0x3f0] sm:$0xff]  ;;  %v195_v32 = vld [vmem:[#allocation2 + $0x3f8] sm:$0xff]  ;;  %v257_v31 = vpack.c.bf16 %v193_v25, %v189_v24 }
 0x141   :  { %v258_v39 = vpack.c.bf16 %v194_v26, %v190_v61  ;;  %v1604_v26 = vld [vmem:[%s1673_s4] ss:$0 sm:$0xff]  ;;  %s1478_s4 = smov [#allocation8]  }
 0x142   :  { %860 = vmatmul.bf16.gmra.mxu3 %v251_v30  ;;  %v912_v2 = vpack.c.bf16 %v885_v37, %v884_v33  ;;  %v732_v38 = vpop.f32.mrf.mxu2  ;;  %v191_v30 = vld [vmem:[#allocation2 + $0x3d8] sm:$0xff]  ;;  %s1117_s12 = sshll.u32 %s1478_s4, 4  ;;  %s1118_s12 = int_to_ptr.vmem [resolvable:$true] %s1117_s12 }
 0x143   :  { %v733_v46 = vadd.f32 %v732_v38, %v644_v42 }
 0x144   :  { %1020 = vmatmul.bf16.gmra.mxu0 %v912_v2  ;;  %v645_v41 = vpop.f32.mrf.mxu1 }
 0x145   :  { %v821_v40 = vpop.f32.mrf.mxu3  ;;  %v646_v55 = vadd.f32 %v645_v41, %v557_v43  ;;  %v259_v41 = vpack.c.bf16 %v195_v32, %v191_v30 }
 0x146   :  { %v822_v59 = vadd.f32 %v821_v40, %v733_v46 }
 0x148   :  { %v886_v9 = vmax.f32 %v822_v59, 0.0 }
 0x14a   :  { %v734_v58 = vpop.f32.mrf.mxu2 }
 0x14b   :  { %v735_v60 = vadd.f32 %v734_v58, %v646_v55 }
 0x14c   :  { %v648_v5 = vpop.f32.mrf.mxu1 }
 0x14d   :  { %v823_v62 = vpop.f32.mrf.mxu3  ;;  %v649_v21 = vadd.f32 %v648_v5, %v560_v15 }
 0x14e   :  { %v824_v7 = vadd.f32 %v823_v62, %v735_v60 }
 0x14f   :  { %687 = vmatmul.bf16.gmra.mxu1 %v253_v14  ;;  %776 = vmatmul.bf16.gmra.mxu2 %v254_v4 }
 0x150   :  { %v887_v12 = vmax.f32 %v824_v7, 0.0 }
 0x152   :  { %865 = vmatmul.bf16.gmra.mxu3 %v255_v6  ;;  %v913_v19 = vpack.c.bf16 %v887_v12, %v886_v9  ;;  %v737_v13 = vpop.f32.mrf.mxu2 }
 0x153   :  { %v738_v23 = vadd.f32 %v737_v13, %v649_v21 }
 0x154   :  { %1025 = vmatmul.bf16.gmra.mxu0 %v913_v19  ;;  %v650_v20 = vpop.f32.mrf.mxu1 }
 0x155   :  { %v826_v16 = vpop.f32.mrf.mxu3  ;;  %v651_v29 = vadd.f32 %v650_v20, %v562_v22 }
 0x156   :  { %v827_v37 = vadd.f32 %v826_v16, %v738_v23 }
 0x158   :  { %v888_v43 = vmax.f32 %v827_v37, 0.0  ;;  %v575_v37 = vadd.f32 %v1571_v8, %v1534_v17 }
 0x15a   :  { %v739_v33 = vpop.f32.mrf.mxu2 }
 0x15b   :  { %v740_v2 = vadd.f32 %v739_v33, %v651_v29 }
 0x15c   :  { %v653_v40 = vpop.f32.mrf.mxu1 }
 0x15d   :  { %v828_v38 = vpop.f32.mrf.mxu3  ;;  %v654_v55 = vadd.f32 %v653_v40, %v565_v49 }
 0x15e   :  { %v829_v42 = vadd.f32 %v828_v38, %v740_v2 }
 0x15f   :  { %692 = vmatmul.bf16.gmra.mxu1 %v257_v31  ;;  %781 = vmatmul.bf16.gmra.mxu2 %v258_v39  ;;  %v577_v39 = vadd.f32 %v1571_v8, %v1540_v27  ;;  %v580_v27 = vadd.f32 %v1571_v8, %v1546_v34 }
 0x160   :  { %v889_v46 = vmax.f32 %v829_v42, 0.0 }
 0x162   :  { %870 = vmatmul.bf16.gmra.mxu3 %v259_v41  ;;  %v914_v36 = vpack.c.bf16 %v889_v46, %v888_v43  ;;  %v742_v47 = vpop.f32.mrf.mxu2 }
 0x163   :  { %v743_v57 = vadd.f32 %v742_v47, %v654_v55 }
 0x164   :  { %1030 = vmatmul.bf16.gmra.mxu0 %v914_v36  ;;  %v655_v51 = vpop.f32.mrf.mxu1 }
 0x165   :  { %v831_v50 = vpop.f32.mrf.mxu3  ;;  %v656_v58 = vadd.f32 %v655_v51, %v567_v56 }
 0x166   :  { %v832_v60 = vadd.f32 %v831_v50, %v743_v57 }
 0x168   :  { %v890_v6 = vmax.f32 %v832_v60, 0.0 }
 0x16a   :  { %v744_v59 = vpop.f32.mrf.mxu2 }
 0x16b   :  { %v745_v62 = vadd.f32 %v744_v59, %v656_v58 }
 0x16c   :  { %v658_v4 = vpop.f32.mrf.mxu1 }
 0x16d   :  { %v833_v14 = vpop.f32.mrf.mxu3  ;;  %v659_v15 = vadd.f32 %v658_v4, %v570_v48  ;;  %v582_v4 = vadd.f32 %v1571_v8, %v1552_v44  ;;  %v585_v44 = vadd.f32 %v1571_v8, %v1558_v52 }
 0x16e   :  { %v834_v5 = vadd.f32 %v833_v14, %v745_v62 }
 0x170   :  { %v891_v7 = vmax.f32 %v834_v5, 0.0 }
 0x172   :  { %v915_v9 = vpack.c.bf16 %v891_v7, %v890_v6  ;;  %v747_v12 = vpop.f32.mrf.mxu2 }
 0x173   :  { %v748_v16 = vadd.f32 %v747_v12, %v659_v15 }
 0x174   :  { %1035 = vmatmul.bf16.gmra.mxu0 %v915_v9  ;;  %v660_v13 = vpop.f32.mrf.mxu1 }
 0x175   :  { %v836_v19 = vpop.f32.mrf.mxu3  ;;  %v661_v20 = vadd.f32 %v660_v13, %v572_v54 }
 0x176   :  { %v837_v22 = vadd.f32 %v836_v19, %v748_v16 }
 0x178   :  { %v892_v0 = vmax.f32 %v837_v22, 0.0 }
 0x17a   :  { %v749_v21 = vpop.f32.mrf.mxu2 }
 0x17b   :  { %v750_v23 = vadd.f32 %v749_v21, %v661_v20 }
 0x17c   :  { %v663_v25 = vpop.f32.mrf.mxu1 }
 0x17d   :  { %v838_v24 = vpop.f32.mrf.mxu3  ;;  %v664_v31 = vadd.f32 %v663_v25, %v575_v37 }
 0x17e   :  { %v839_v61 = vadd.f32 %v838_v24, %v750_v23 }
 0x180   :  { %v893_v29 = vmax.f32 %v839_v61, 0.0 }
 0x181   :  { %v1001_v30 = vpop.f32.mrf.mxu0 }
 0x182   :  { %v916_v32 = vpack.c.bf16 %v893_v29, %v892_v0  ;;  %v1002_v33 = vadd.f32 %v1604_v26, %v1001_v30  ;;  %v752_v10 = vpop.f32.mrf.mxu2  ;;  %v587_v0 = vadd.f32 %v1571_v8, %v1564_v63  ;;  %v590_v63 = vadd.f32 %v1571_v8, %v1524_v1 }
 0x183   :  { %v753_v40 = vadd.f32 %v752_v10, %v664_v31 }
 0x184   :  { %1081 = vst [vmem:[#allocation8] sm:$0xff] %v1002_v33  ;;  %1040 = vmatmul.bf16.gmra.mxu0 %v916_v32  ;;  %v665_v38 = vpop.f32.mrf.mxu1 }
 0x185   :  { %v841_v2 = vpop.f32.mrf.mxu3  ;;  %v666_v42 = vadd.f32 %v665_v38, %v577_v39 }
 0x186   :  { %v842_v36 = vadd.f32 %v841_v2, %v753_v40 }
 0x188   :  { %v894_v51 = vmax.f32 %v842_v36, 0.0 }
 0x189   :  { %v1003_v41 = vpop.f32.mrf.mxu0 }
 0x18a   :  { %v1004_v43 = vadd.f32 %v1604_v26, %v1003_v41  ;;  %v754_v46 = vpop.f32.mrf.mxu2 }
 0x18b   :  { %v755_v47 = vadd.f32 %v754_v46, %v666_v42 }
 0x18c   :  { %1082 = vst [vmem:[#allocation8 + $0x8] sm:$0xff] %v1004_v43  ;;  %v668_v50 = vpop.f32.mrf.mxu1 }
 0x18d   :  { %v843_v49 = vpop.f32.mrf.mxu3  ;;  %v669_v14 = vadd.f32 %v668_v50, %v580_v27  ;;  %v592_v50 = vadd.f32 %v1571_v8, %v1530_v11  ;;  %v595_v11 = vadd.f32 %v1571_v8, %v1536_v18 }
 0x18e   :  { %v844_v17 = vadd.f32 %v843_v49, %v755_v47 }
 0x190   :  { %v895_v55 = vmax.f32 %v844_v17, 0.0 }
 0x191   :  { %v1006_v56 = vpop.f32.mrf.mxu0 }
 0x192   :  { %v917_v57 = vpack.c.bf16 %v895_v55, %v894_v51  ;;  %v1007_v58 = vadd.f32 %v1604_v26, %v1006_v56  ;;  %v757_v59 = vpop.f32.mrf.mxu2 }
 0x193   :  { %v758_v5 = vadd.f32 %v757_v59, %v669_v14 }
 0x194   :  { %1083 = vst [vmem:[#allocation8 + $0x10] sm:$0xff] %v1007_v58  ;;  %1045 = vmatmul.bf16.gmra.mxu0 %v917_v57  ;;  %v670_v62 = vpop.f32.mrf.mxu1 }
 0x195   :  { %v846_v60 = vpop.f32.mrf.mxu3  ;;  %v671_v7 = vadd.f32 %v670_v62, %v582_v4 }
 0x196   :  { %v847_v48 = vadd.f32 %v846_v60, %v758_v5 }
 0x198   :  { %v896_v54 = vmax.f32 %v847_v48, 0.0 }
 0x199   :  { %v1008_v6 = vpop.f32.mrf.mxu0 }
 0x19a   :  { %v1009_v9 = vadd.f32 %v1604_v26, %v1008_v6  ;;  %v759_v12 = vpop.f32.mrf.mxu2 }
 0x19b   :  { %v760_v19 = vadd.f32 %v759_v12, %v671_v7 }
 0x19c   :  { %1084 = vst [vmem:[#allocation8 + $0x18] sm:$0xff] %v1009_v9  ;;  %v673_v15 = vpop.f32.mrf.mxu1 }
 0x19d   :  { %v848_v13 = vpop.f32.mrf.mxu3  ;;  %v674_v61 = vadd.f32 %v673_v15, %v585_v44 }
 0x19e   :  { %v849_v34 = vadd.f32 %v848_v13, %v760_v19  ;;  %v597_v19 = vadd.f32 %v1571_v8, %v1542_v28  ;;  %v600_v28 = vadd.f32 %v1571_v8, %v1548_v35 }
 0x1a0   :  { %v897_v16 = vmax.f32 %v849_v34, 0.0 }
 0x1a1   :  { %v1011_v20 = vpop.f32.mrf.mxu0 }
 0x1a2   :  { %v918_v21 = vpack.c.bf16 %v897_v16, %v896_v54  ;;  %v1012_v22 = vadd.f32 %v1604_v26, %v1011_v20  ;;  %v762_v23 = vpop.f32.mrf.mxu2 }
 0x1a3   :  { %v763_v29 = vadd.f32 %v762_v23, %v674_v61 }
 0x1a4   :  { %1085 = vst [vmem:[#allocation8 + $0x20] sm:$0xff] %v1012_v22  ;;  %1050 = vmatmul.bf16.gmra.mxu0 %v918_v21  ;;  %v675_v25 = vpop.f32.mrf.mxu1 }
 0x1a5   :  { %v851_v24 = vpop.f32.mrf.mxu3  ;;  %v676_v32 = vadd.f32 %v675_v25, %v587_v0 }
 0x1a6   :  { %v852_v37 = vadd.f32 %v851_v24, %v763_v29 }
 0x1a8   :  { %v898_v39 = vmax.f32 %v852_v37, 0.0 }
 0x1a9   :  { %v1013_v30 = vpop.f32.mrf.mxu0 }
 0x1aa   :  { %v1014_v33 = vadd.f32 %v1604_v26, %v1013_v30  ;;  %v764_v10 = vpop.f32.mrf.mxu2 }
 0x1ab   :  { %v765_v2 = vadd.f32 %v764_v10, %v676_v32  ;;  %v602_v10 = vadd.f32 %v1571_v8, %v1554_v45  ;;  %v605_v45 = vadd.f32 %v1571_v8, %v1560_v53 }
 0x1ac   :  { %1086 = vst [vmem:[#allocation8 + $0x28] sm:$0xff] %v1014_v33  ;;  %v678_v31 = vpop.f32.mrf.mxu1 }
 0x1ad   :  { %v853_v38 = vpop.f32.mrf.mxu3  ;;  %v679_v49 = vadd.f32 %v678_v31, %v590_v63 }
 0x1ae   :  { %v854_v52 = vadd.f32 %v853_v38, %v765_v2 }
 0x1b0   :  { %v899_v40 = vmax.f32 %v854_v52, 0.0 }
 0x1b1   :  { %v1016_v41 = vpop.f32.mrf.mxu0 }
 0x1b2   :  { %v919_v42 = vpack.c.bf16 %v899_v40, %v898_v39  ;;  %v1017_v43 = vadd.f32 %v1604_v26, %v1016_v41  ;;  %v767_v46 = vpop.f32.mrf.mxu2 }
 0x1b3   :  { %v768_v17 = vadd.f32 %v767_v46, %v679_v49 }
 0x1b4   :  { %1087 = vst [vmem:[#allocation8 + $0x30] sm:$0xff] %v1017_v43  ;;  %1055 = vmatmul.bf16.gmra.mxu0 %v919_v42  ;;  %v680_v47 = vpop.f32.mrf.mxu1 }
 0x1b5   :  { %v856_v36 = vpop.f32.mrf.mxu3  ;;  %v681_v55 = vadd.f32 %v680_v47, %v592_v50 }
 0x1b6   :  { %v857_v58 = vadd.f32 %v856_v36, %v768_v17 }
 0x1b8   :  { %v900_v62 = vmax.f32 %v857_v58, 0.0 }
 0x1b9   :  { %v1018_v51 = vpop.f32.mrf.mxu0 }
 0x1ba   :  { %v1019_v56 = vadd.f32 %v1604_v26, %v1018_v51  ;;  %v769_v57 = vpop.f32.mrf.mxu2 }
 0x1bb   :  { %v770_v59 = vadd.f32 %v769_v57, %v681_v55  ;;  %v607_v55 = vadd.f32 %v1571_v8, %v1566_v3 }
 0x1bc   :  { %1088 = vst [vmem:[#allocation8 + $0x38] sm:$0xff] %v1019_v56  ;;  %v683_v60 = vpop.f32.mrf.mxu1 }
 0x1bd   :  { %v858_v27 = vpop.f32.mrf.mxu3  ;;  %v684_v48 = vadd.f32 %v683_v60, %v595_v11 }
 0x1be   :  { %v859_v1 = vadd.f32 %v858_v27, %v770_v59 }
 0x1c0   :  { %v901_v14 = vmax.f32 %v859_v1, 0.0 }
 0x1c1   :  { %v1021_v4 = vpop.f32.mrf.mxu0 }
 0x1c2   :  { %v920_v5 = vpack.c.bf16 %v901_v14, %v900_v62  ;;  %v1022_v6 = vadd.f32 %v1604_v26, %v1021_v4  ;;  %v772_v7 = vpop.f32.mrf.mxu2 }
 0x1c3   :  { %v773_v13 = vadd.f32 %v772_v7, %v684_v48 }
 0x1c4   :  { %1089 = vst [vmem:[#allocation8 + $0x40] sm:$0xff] %v1022_v6  ;;  %1060 = vmatmul.bf16.gmra.mxu0 %v920_v5  ;;  %v685_v12 = vpop.f32.mrf.mxu1 }
 0x1c5   :  { %v861_v9 = vpop.f32.mrf.mxu3  ;;  %v686_v34 = vadd.f32 %v685_v12, %v597_v19 }
 0x1c6   :  { %v862_v20 = vadd.f32 %v861_v9, %v773_v13 }
 0x1c8   :  { %v902_v44 = vmax.f32 %v862_v20, 0.0 }
 0x1c9   :  { %v1023_v15 = vpop.f32.mrf.mxu0 }
 0x1ca   :  { %v1024_v54 = vadd.f32 %v1604_v26, %v1023_v15  ;;  %v774_v16 = vpop.f32.mrf.mxu2 }
 0x1cb   :  { %v775_v21 = vadd.f32 %v774_v16, %v686_v34 }
 0x1cc   :  { %1090 = vst [vmem:[#allocation8 + $0x48] sm:$0xff] %v1024_v54  ;;  %v688_v23 = vpop.f32.mrf.mxu1 }
 0x1cd   :  { %v863_v22 = vpop.f32.mrf.mxu3  ;;  %v689_v33 = vadd.f32 %v688_v23, %v600_v28 }
 0x1ce   :  { %v864_v18 = vadd.f32 %v863_v22, %v775_v21 }
 0x1d0   :  { %v903_v24 = vmax.f32 %v864_v18, 0.0 }
 0x1d1   :  { %v1026_v25 = vpop.f32.mrf.mxu0 }
 0x1d2   :  { %v921_v61 = vpack.c.bf16 %v903_v24, %v902_v44  ;;  %v1027_v0 = vadd.f32 %v1604_v26, %v1026_v25  ;;  %v777_v29 = vpop.f32.mrf.mxu2 }
 0x1d3   :  { %v778_v37 = vadd.f32 %v777_v29, %v689_v33 }
 0x1d4   :  { %1091 = vst [vmem:[#allocation8 + $0x50] sm:$0xff] %v1027_v0  ;;  %1065 = vmatmul.bf16.gmra.mxu0 %v921_v61  ;;  %v690_v32 = vpop.f32.mrf.mxu1 }
 0x1d5   :  { %v866_v30 = vpop.f32.mrf.mxu3  ;;  %v691_v38 = vadd.f32 %v690_v32, %v602_v10 }
 0x1d6   :  { %v867_v39 = vadd.f32 %v866_v30, %v778_v37 }
 0x1d8   :  { %v904_v43 = vmax.f32 %v867_v39, 0.0 }
 0x1d9   :  { %v1028_v2 = vpop.f32.mrf.mxu0 }
 0x1da   :  { %v1029_v31 = vadd.f32 %v1604_v26, %v1028_v2  ;;  %v779_v52 = vpop.f32.mrf.mxu2 }
 0x1db   :  { %v780_v40 = vadd.f32 %v779_v52, %v691_v38 }
 0x1dc   :  { %1092 = vst [vmem:[#allocation8 + $0x58] sm:$0xff] %v1029_v31  ;;  %v693_v42 = vpop.f32.mrf.mxu1 }
 0x1dd   :  { %v868_v41 = vpop.f32.mrf.mxu3  ;;  %v694_v17 = vadd.f32 %v693_v42, %v605_v45 }
 0x1de   :  { %v869_v35 = vadd.f32 %v868_v41, %v780_v40 }
 0x1e0   :  { %v905_v46 = vmax.f32 %v869_v35, 0.0 }
 0x1e1   :  { %v1031_v63 = vpop.f32.mrf.mxu0 }
 0x1e2   :  { %v922_v36 = vpack.c.bf16 %v905_v46, %v904_v43  ;;  %v1032_v47 = vadd.f32 %v1604_v26, %v1031_v63  ;;  %v782_v49 = vpop.f32.mrf.mxu2 }
 0x1e3   :  { %v783_v56 = vadd.f32 %v782_v49, %v694_v17 }
 0x1e4   :  { %1093 = vst [vmem:[#allocation8 + $0x60] sm:$0xff] %v1032_v47  ;;  %1070 = vmatmul.bf16.gmra.mxu0 %v922_v36  ;;  %v695_v51 = vpop.f32.mrf.mxu1 }
 0x1e5   :  { %v871_v50 = vpop.f32.mrf.mxu3  ;;  %v696_v58 = vadd.f32 %v695_v51, %v607_v55 }
 0x1e6   :  { %v872_v60 = vadd.f32 %v871_v50, %v783_v56 }
 0x1e8   :  { %v906_v53 = vmax.f32 %v872_v60, 0.0 }
 0x1e9   :  { %v1033_v57 = vpop.f32.mrf.mxu0 }
 0x1ea   :  { %v1034_v59 = vadd.f32 %v1604_v26, %v1033_v57  ;;  %v784_v27 = vpop.f32.mrf.mxu2 }
 0x1eb   :  { %v785_v1 = vadd.f32 %v784_v27, %v696_v58 }
 0x1ec   :  { %1094 = vst [vmem:[#allocation8 + $0x68] sm:$0xff] %v1034_v59 }
 0x1ed   :  { %v873_v62 = vpop.f32.mrf.mxu3 }
 0x1ee   :  { %v874_v14 = vadd.f32 %v873_v62, %v785_v1 }
 0x1f0   :  { %v907_v4 = vmax.f32 %v874_v14, 0.0 }
 0x1f1   :  { %v1036_v5 = vpop.f32.mrf.mxu0 }
 0x1f2   :  { %v923_v6 = vpack.c.bf16 %v907_v4, %v906_v53  ;;  %v1037_v7 = vadd.f32 %v1604_v26, %v1036_v5 }
 0x1f4   :  { %1095 = vst [vmem:[#allocation8 + $0x70] sm:$0xff] %v1037_v7  ;;  %1075 = vmatmul.bf16.gmra.mxu0 %v923_v6 }
 0x1f9   :  { %v1038_v3 = vpop.f32.mrf.mxu0 }
 0x1fa   :  { %v1039_v8 = vadd.f32 %v1604_v26, %v1038_v3 }
 0x1fc   :  { %1096 = vst [vmem:[#allocation8 + $0x78] sm:$0xff] %v1039_v8 }
 0x201   :  { %v1041_v11 = vpop.f32.mrf.mxu0 }
 0x202   :  { %v1042_v9 = vadd.f32 %v1604_v26, %v1041_v11 }
 0x204   :  { %1097 = vst [vmem:[#allocation8 + $0x80] sm:$0xff] %v1042_v9 }
 0x209   :  { %v1043_v12 = vpop.f32.mrf.mxu0 }
 0x20a   :  { %v1044_v48 = vadd.f32 %v1604_v26, %v1043_v12 }
 0x20c   :  { %1098 = vst [vmem:[#allocation8 + $0x88] sm:$0xff] %v1044_v48 }
 0x211   :  { %v1046_v19 = vpop.f32.mrf.mxu0 }
 0x212   :  { %v1047_v13 = vadd.f32 %v1604_v26, %v1046_v19 }
 0x214   :  { %1099 = vst [vmem:[#allocation8 + $0x90] sm:$0xff] %v1047_v13 }
 0x219   :  { %v1048_v15 = vpop.f32.mrf.mxu0 }
 0x21a   :  { %v1049_v34 = vadd.f32 %v1604_v26, %v1048_v15 }
 0x21c   :  { %1100 = vst [vmem:[#allocation8 + $0x98] sm:$0xff] %v1049_v34 }
 0x221   :  { %v1051_v54 = vpop.f32.mrf.mxu0 }
 0x222   :  { %v1052_v16 = vadd.f32 %v1604_v26, %v1051_v54 }
 0x224   :  { %1101 = vst [vmem:[#allocation8 + $0xa0] sm:$0xff] %v1052_v16 }
 0x229   :  { %v1053_v20 = vpop.f32.mrf.mxu0 }
 0x22a   :  { %v1054_v21 = vadd.f32 %v1604_v26, %v1053_v20 }
 0x22c   :  { %1102 = vst [vmem:[#allocation8 + $0xa8] sm:$0xff] %v1054_v21 }
 0x231   :  { %v1056_v22 = vpop.f32.mrf.mxu0 }
 0x232   :  { %v1057_v23 = vadd.f32 %v1604_v26, %v1056_v22 }
 0x234   :  { %1103 = vst [vmem:[#allocation8 + $0xb0] sm:$0xff] %v1057_v23 }
 0x239   :  { %v1058_v18 = vpop.f32.mrf.mxu0 }
 0x23a   :  { %v1059_v44 = vadd.f32 %v1604_v26, %v1058_v18 }
 0x23c   :  { %1104 = vst [vmem:[#allocation8 + $0xb8] sm:$0xff] %v1059_v44 }
 0x241   :  { %v1061_v24 = vpop.f32.mrf.mxu0 }
 0x242   :  { %v1062_v25 = vadd.f32 %v1604_v26, %v1061_v24 }
 0x244   :  { %1105 = vst [vmem:[#allocation8 + $0xc0] sm:$0xff] %v1062_v25 }
 0x249   :  { %v1063_v61 = vpop.f32.mrf.mxu0 }
 0x24a   :  { %v1064_v0 = vadd.f32 %v1604_v26, %v1063_v61 }
 0x24c   :  { %1106 = vst [vmem:[#allocation8 + $0xc8] sm:$0xff] %v1064_v0 }
 0x251   :  { %v1066_v29 = vpop.f32.mrf.mxu0 }
 0x252   :  { %v1067_v28 = vadd.f32 %v1604_v26, %v1066_v29 }
 0x254   :  { %1107 = vst [vmem:[#allocation8 + $0xd0] sm:$0xff] %v1067_v28 }
 0x259   :  { %v1068_v30 = vpop.f32.mrf.mxu0 }
 0x25a   :  { %v1069_v32 = vadd.f32 %v1604_v26, %v1068_v30 }
 0x25c   :  { %1108 = vst [vmem:[#allocation8 + $0xd8] sm:$0xff] %v1069_v32 }
 0x261   :  { %v1071_v33 = vpop.f32.mrf.mxu0 }
 0x262   :  { %v1072_v10 = vadd.f32 %v1604_v26, %v1071_v33 }
 0x264   :  { %1109 = vst [vmem:[#allocation8 + $0xe0] sm:$0xff] %v1072_v10 }
 0x269   :  { %v1073_v37 = vpop.f32.mrf.mxu0 }
 0x26a   :  { %v1074_v2 = vadd.f32 %v1604_v26, %v1073_v37 }
 0x26c   :  { %1110 = vst [vmem:[#allocation8 + $0xe8] sm:$0xff] %v1074_v2 }
 0x271   :  { %v1076_v38 = vpop.f32.mrf.mxu0 }
 0x272   :  { %v1077_v31 = vadd.f32 %v1604_v26, %v1076_v38 }
 0x274   :  { %1111 = vst [vmem:[#allocation8 + $0xf0] sm:$0xff] %v1077_v31 }
 0x279   :  { %v1078_v52 = vpop.f32.mrf.mxu0 }
 0x27a   :  { %v1079_v39 = vadd.f32 %v1604_v26, %v1078_v52 }
 0x27c   :  { %1112 = vst [vmem:[#allocation8 + $0xf8] sm:$0xff] %v1079_v39 }
 0x27d   :  { %1125 = dma.vmem_to_hbm [thread:$0]  %s1118_s12, 4096, %s1120_s15, [#allocation4], %s1479_s16, %s1479_s16, %s1480_s17  }
 0x27e   :  { %1469 = dma.done.wait [#allocation4], 4096  }
 0x27f   :  { %1470 = vsyncadd [#allocation4], 4294963200 }
 0x280   :  { %1130 = vsyncpa [#allocation3], 1 }
 0x281   :  { %1131 = vsyncpa [#allocation6], 1 }
 0x282   :  { %1132 = vsyncpa [#allocation4], 1 }

</bundles_post_ra>
